<compile_context>
chip_gen: v5e
topology: v5e:2x2
jax: 0.10.0
libtpu: 0.0.40
codegen_flags: <defaults>
</compile_context>

<pallas_src>
import functools
import math

import jax
import jax.numpy as jnp
from jax import lax
from jax.experimental import pallas as pl
from jax.experimental.pallas import tpu as pltpu


def self_attention_kernel(x_ref, gamma_ref, beta_ref, wq_ref, bq_ref,
                          wkv_ref, bkv_ref, wp_ref, bp_ref, out_ref,
                          attn_scratch, *, num_heads: int, eps: float,
                          q_tile: int, num_q_tiles: int):
    # x_ref:   (1, N, C) f32   one batch row (full sequence, needed for K/V)
    # gamma/beta: (1, C) f32
    # wq:  (C, C)  bf16 (softmax scale pre-folded)    bq:  (1, C)  f32 (scaled)
    # wkv: (C, 2C) bf16                               bkv: (1, 2C) f32
    # wp:  (C, C)  bf16                               bp:  (1, C)  f32
    # out_ref: (1, q_tile, C) f32
    # attn_scratch: (q_tile, C) bf16 VMEM scratch (per-head outputs)
    x = x_ref[0]                                   # (N, C) f32
    n, c = x.shape
    hd = c // num_heads

    # ---- LayerNorm in f32 (biased variance, matches torch.nn.LayerNorm) ----
    mean = jnp.mean(x, axis=-1, keepdims=True)
    xc = x - mean
    var = jnp.mean(xc * xc, axis=-1, keepdims=True)
    xn = (xc * lax.rsqrt(var + eps)) * gamma_ref[...] + beta_ref[...]
    xn_b = xn.astype(jnp.bfloat16)                 # bf16 operand for MXU

    # ---- query-tile slice (residual + LN rows for this grid step) ----
    if num_q_tiles == 1:
        x_tile = x
        xn_tile_b = xn_b
    else:
        start = pl.multiple_of(pl.program_id(1) * q_tile, q_tile)
        x_tile = lax.dynamic_slice_in_dim(x, start, q_tile, axis=0)
        xn_tile_b = lax.dynamic_slice_in_dim(xn_b, start, q_tile, axis=0)

    # ---- projections: bf16 operands, f32 accumulation ----
    # scale is already folded into wq / bq host-side.
    q = jnp.dot(xn_tile_b, wq_ref[...],
                preferred_element_type=jnp.float32) + bq_ref[...]       # (tq, C)
    kv = jnp.dot(xn_b, wkv_ref[...],
                 preferred_element_type=jnp.float32) + bkv_ref[...]     # (N, 2C)
    q_b = q.astype(jnp.bfloat16)
    kv_b = kv.astype(jnp.bfloat16)

    # ---- per-head attention, outputs written into VMEM scratch ----
    for h in range(num_heads):
        qh = q_b[:, h * hd:(h + 1) * hd]                      # (tq, hd)
        kh = kv_b[:, h * hd:(h + 1) * hd]                     # (N, hd)
        vh = kv_b[:, c + h * hd:c + (h + 1) * hd]             # (N, hd)

        # q @ k^T (scale pre-folded), f32 accumulation
        s = lax.dot_general(qh, kh, (((1,), (1,)), ((), ())),
                            preferred_element_type=jnp.float32)         # (tq, N)
        s = s - jnp.max(s, axis=-1, keepdims=True)
        p = jnp.exp(s)                                                   # f32
        l = jnp.sum(p, axis=-1, keepdims=True)                           # (tq, 1)
        # TODO(synk): attention dropout omitted (eval-mode identity).
        o = jnp.dot(p.astype(jnp.bfloat16), vh,
                    preferred_element_type=jnp.float32)                  # (tq, hd)
        # deferred softmax normalization: (tq, hd) multiply + EUP reciprocal
        o = o * pl.reciprocal(l, approx=True)
        attn_scratch[:, h * hd:(h + 1) * hd] = o.astype(attn_scratch.dtype)

    # ---- output projection (one wide matmul) + residual ----
    proj = jnp.dot(attn_scratch[...], wp_ref[...],
                   preferred_element_type=jnp.float32) + bp_ref[...]
    # TODO(synk): proj dropout omitted (eval-mode identity).
    out_ref[0] = (proj + x_tile).astype(out_ref.dtype)


def _pick_vmem_limit() -> int:
    """~75% of physical VMEM, capped at 100 MiB (v5e/v6e: 96 MiB, v7x: 48 MiB)."""
    cap = 128 * 1024 * 1024
    try:
        info = pltpu.get_tpu_info()
        cap = int(getattr(info, "vmem_capacity_bytes", cap))
    except Exception:
        pass
    return int(min(cap * 3 // 4, 100 * 1024 * 1024))


def _pick_q_tile(n: int) -> int:
    """Whole sequence when small; otherwise the largest 8-aligned divisor tile."""
    if n <= 1024:
        return n
    for t in (1024, 512, 256, 128, 64, 32, 16, 8):
        if n % t == 0:
            return t
    return n  # TODO(synk): ragged N falls back to a single whole-sequence tile


def self_attention(x, params, *, num_heads: int = 4, eps: float = 1e-5):
    """x: (B, N, C) or (B, C). params: (gamma, beta, w_qkv, b_qkv, w_proj, b_proj)
    with linear weights already in (in, out) layout (i.e. torch weight.T)."""
    x = jnp.asarray(x, jnp.float32)
    squeeze = (x.ndim == 2)
    if squeeze:
        x = x[:, None, :]
    b, n, c = x.shape
    assert c % num_heads == 0, "dim must be divisible by num_heads"
    hd = c // num_heads
    scale = hd ** (-0.5)

    gamma, beta, w_qkv, b_qkv, w_proj, b_proj = params
    gamma2 = jnp.asarray(gamma, jnp.float32).reshape(1, c)
    beta2 = jnp.asarray(beta, jnp.float32).reshape(1, c)
    w_qkv = jnp.asarray(w_qkv, jnp.float32)
    b_qkv2 = jnp.asarray(b_qkv, jnp.float32).reshape(1, 3 * c)
    # Fold softmax scale into the q projection; cast matmul weights to bf16.
    w_q = (w_qkv[:, :c] * scale).astype(jnp.bfloat16)          # (C, C)
    b_q = b_qkv2[:, :c] * scale                                 # (1, C) f32
    w_kv = w_qkv[:, c:].astype(jnp.bfloat16)                    # (C, 2C)
    b_kv = b_qkv2[:, c:]                                        # (1, 2C) f32
    w_p = jnp.asarray(w_proj, jnp.float32).astype(jnp.bfloat16)  # (C, C)
    b_p = jnp.asarray(b_proj, jnp.float32).reshape(1, c)

    q_tile = _pick_q_tile(n)
    num_q_tiles = n // q_tile if n % q_tile == 0 else 1
    if n % q_tile != 0:
        q_tile = n

    kernel = functools.partial(self_attention_kernel, num_heads=num_heads,
                               eps=eps, q_tile=q_tile, num_q_tiles=num_q_tiles)

    # Advisory cost estimate for XLA scheduling.
    per_step_flops = (2 * q_tile * c * c        # q projection
                      + 2 * n * c * 2 * c       # kv projection
                      + 2 * q_tile * n * c      # scores
                      + 2 * q_tile * n * c      # p @ v
                      + 2 * q_tile * c * c)     # output projection
    cost = pl.CostEstimate(
        flops=int(b * num_q_tiles * per_step_flops),
        transcendentals=int(b * num_q_tiles * num_heads * q_tile * n),
        bytes_accessed=int(8 * b * n * c                    # x in + out (f32)
                           + 2 * (4 * c * c)                 # bf16 weights
                           + 4 * (8 * c)))                   # f32 biases / LN params

    def build(single_buffer_weights: bool):
        def const_spec(shape):
            if single_buffer_weights:
                return pl.BlockSpec(shape, lambda bi, qi: (0, 0),
                                    pipeline_mode=pl.Buffered(1))
            return pl.BlockSpec(shape, lambda bi, qi: (0, 0))

        return pl.pallas_call(
            kernel,
            out_shape=jax.ShapeDtypeStruct((b, n, c), jnp.float32),
            grid=(b, num_q_tiles),
            in_specs=[
                pl.BlockSpec((1, n, c), lambda bi, qi: (bi, 0, 0)),  # x (full seq)
                const_spec((1, c)),          # gamma
                const_spec((1, c)),          # beta
                const_spec((c, c)),          # w_q (scaled, bf16)
                const_spec((1, c)),          # b_q (scaled)
                const_spec((c, 2 * c)),      # w_kv (bf16)
                const_spec((1, 2 * c)),      # b_kv
                const_spec((c, c)),          # w_proj (bf16)
                const_spec((1, c)),          # b_proj
            ],
            out_specs=pl.BlockSpec((1, q_tile, c), lambda bi, qi: (bi, qi, 0)),
            scratch_shapes=[pltpu.VMEM((q_tile, c), jnp.bfloat16)],
            compiler_params=pltpu.CompilerParams(
                dimension_semantics=("parallel", "parallel"),
                vmem_limit_bytes=_pick_vmem_limit()),
            cost_estimate=cost,
        )

    args = (x, gamma2, beta2, w_q, b_q, w_kv, b_kv, w_p, b_p)
    try:
        out = build(True)(*args)
    except Exception:
        # TODO(synk): pl.Buffered(1) single-buffering unsupported on this jax
        # version; fall back to default double-buffered weight blocks.
        out = build(False)(*args)

    if squeeze:
        out = out[:, 0, :]
    return out


def _reference(x, params, num_heads, eps=1e-5):
    """Pure-JAX (f32) mirror of the PyTorch SelfAttention.forward (eval mode)."""
    gamma, beta, w_qkv, b_qkv, w_proj, b_proj = params
    squeeze = (x.ndim == 2)
    if squeeze:
        x = x[:, None, :]
    b, n, c = x.shape
    hd = c // num_heads
    scale = hd ** (-0.5)

    mean = x.mean(-1, keepdims=True)
    var = ((x - mean) ** 2).mean(-1, keepdims=True)
    xn = (x - mean) / jnp.sqrt(var + eps) * gamma + beta

    qkv = xn @ w_qkv + b_qkv                                   # (B, N, 3C)
    qkv = qkv.reshape(b, n, 3, num_heads, hd).transpose(2, 0, 3, 1, 4)
    q, k, v = qkv[0], qkv[1], qkv[2]                           # (B, H, N, hd)
    attn = jnp.einsum('bhnd,bhmd->bhnm', q, k) * scale
    attn = jax.nn.softmax(attn, axis=-1)
    o = jnp.einsum('bhnm,bhmd->bhnd', attn, v)
    o = o.transpose(0, 2, 1, 3).reshape(b, n, c)
    o = o @ w_proj + b_proj
    o = o + x
    if squeeze:
        o = o[:, 0, :]
    return o


if __name__ == "__main__":
    key = jax.random.PRNGKey(0)
    B, N, C, H = 2, 8, 32, 4

    k_x, k_g, k_b, k_wq, k_bq, k_wp, k_bp = jax.random.split(key, 7)
    x = jax.random.normal(k_x, (B, N, C), dtype=jnp.float32)

    gamma = 1.0 + 0.1 * jax.random.normal(k_g, (C,), dtype=jnp.float32)
    beta = 0.1 * jax.random.normal(k_b, (C,), dtype=jnp.float32)
    # Linear weights in (in, out) layout == torch weight.T
    w_qkv = jax.random.normal(k_wq, (C, 3 * C), dtype=jnp.float32) / math.sqrt(C)
    b_qkv = 0.1 * jax.random.normal(k_bq, (3 * C,), dtype=jnp.float32)
    w_proj = jax.random.normal(k_wp, (C, C), dtype=jnp.float32) / math.sqrt(C)
    b_proj = 0.1 * jax.random.normal(k_bp, (C,), dtype=jnp.float32)

    params = (gamma, beta, w_qkv, b_qkv, w_proj, b_proj)

    out = jax.block_until_ready(self_attention(x, params, num_heads=H))
    ref = _reference(x, params, H)

    assert out.shape == (B, N, C)
    max_err = float(jnp.max(jnp.abs(out - ref)))
    # bf16 MXU operands with f32 accumulation -> loosened tolerance vs f32 ref.
    assert jnp.allclose(out, ref, atol=8e-2, rtol=5e-2), max_err

    print("KERNEL_OK")
</pallas_src>

<mosaic_0001>
module attributes {stable_mosaic.version = 11 : i64} {
  func.func @self_attention_kernel(%arg0: i32, %arg1: i32, %arg2: memref<1x8x32xf32, #tpu.memory_space<vmem>>, %arg3: memref<1x32xf32, #tpu.memory_space<vmem>>, %arg4: memref<1x32xf32, #tpu.memory_space<vmem>>, %arg5: memref<32x32xbf16, #tpu.memory_space<vmem>>, %arg6: memref<1x32xf32, #tpu.memory_space<vmem>>, %arg7: memref<32x64xbf16, #tpu.memory_space<vmem>>, %arg8: memref<1x64xf32, #tpu.memory_space<vmem>>, %arg9: memref<32x32xbf16, #tpu.memory_space<vmem>>, %arg10: memref<1x32xf32, #tpu.memory_space<vmem>>, %arg11: memref<1x8x32xf32, #tpu.memory_space<vmem>>, %arg12: memref<8x32xbf16, #tpu.memory_space<vmem>>) attributes {dimension_semantics = [#tpu.dimension_semantics<parallel>, #tpu.dimension_semantics<parallel>], iteration_bounds = array<i64: 2, 1>, scalar_prefetch = 0 : i64, scratch_operands = 1 : i64, tpu.core_type = #tpu.core_type<tc>, window_params = [{transform_indices = @transform_0, window_bounds = array<i64: 1, 8, 32>}, {pipeline_mode = #tpu.pipeline_mode<synchronous>, transform_indices = @transform_1, window_bounds = array<i64: 1, 32>}, {pipeline_mode = #tpu.pipeline_mode<synchronous>, transform_indices = @transform_2, window_bounds = array<i64: 1, 32>}, {pipeline_mode = #tpu.pipeline_mode<synchronous>, transform_indices = @transform_3, window_bounds = array<i64: 32, 32>}, {pipeline_mode = #tpu.pipeline_mode<synchronous>, transform_indices = @transform_4, window_bounds = array<i64: 1, 32>}, {pipeline_mode = #tpu.pipeline_mode<synchronous>, transform_indices = @transform_5, window_bounds = array<i64: 32, 64>}, {pipeline_mode = #tpu.pipeline_mode<synchronous>, transform_indices = @transform_6, window_bounds = array<i64: 1, 64>}, {pipeline_mode = #tpu.pipeline_mode<synchronous>, transform_indices = @transform_7, window_bounds = array<i64: 32, 32>}, {pipeline_mode = #tpu.pipeline_mode<synchronous>, transform_indices = @transform_8, window_bounds = array<i64: 1, 32>}, {transform_indices = @transform_9, window_bounds = array<i64: 1, 8, 32>}]} {
    %c0 = arith.constant 0 : index
    %c0_0 = arith.constant 0 : index
    %c0_1 = arith.constant 0 : index
    %0 = vector.load %arg2[%c0, %c0_0, %c0_1] : memref<1x8x32xf32, #tpu.memory_space<vmem>>, vector<1x8x32xf32>
    %1 = vector.shape_cast %0 : vector<1x8x32xf32> to vector<8x32xf32>
    %cst = arith.constant dense<0.000000e+00> : vector<8xf32>
    %2 = vector.multi_reduction <add>, %1, %cst [1] : vector<8x32xf32> to vector<8xf32>
    %3 = vector.shape_cast %2 : vector<8xf32> to vector<8x1xf32>
    %cst_2 = arith.constant 3.200000e+01 : f32
    %4 = vector.broadcast %cst_2 : f32 to vector<8x1xf32>
    %5 = arith.divf %3, %4 : vector<8x1xf32>
    %6 = vector.broadcast %5 : vector<8x1xf32> to vector<8x32xf32>
    %7 = arith.subf %1, %6 : vector<8x32xf32>
    %8 = arith.mulf %7, %7 : vector<8x32xf32>
    %cst_3 = arith.constant dense<0.000000e+00> : vector<8xf32>
    %9 = vector.multi_reduction <add>, %8, %cst_3 [1] : vector<8x32xf32> to vector<8xf32>
    %10 = vector.shape_cast %9 : vector<8xf32> to vector<8x1xf32>
    %cst_4 = arith.constant 3.200000e+01 : f32
    %11 = vector.broadcast %cst_4 : f32 to vector<8x1xf32>
    %12 = arith.divf %10, %11 : vector<8x1xf32>
    %cst_5 = arith.constant 9.99999974E-6 : f32
    %13 = vector.broadcast %cst_5 : f32 to vector<8x1xf32>
    %14 = arith.addf %12, %13 : vector<8x1xf32>
    %15 = math.rsqrt %14 : vector<8x1xf32>
    %16 = vector.broadcast %15 : vector<8x1xf32> to vector<8x32xf32>
    %17 = arith.mulf %7, %16 : vector<8x32xf32>
    %c0_6 = arith.constant 0 : index
    %c0_7 = arith.constant 0 : index
    %18 = vector.load %arg3[%c0_6, %c0_7] : memref<1x32xf32, #tpu.memory_space<vmem>>, vector<1x32xf32>
    %19 = vector.broadcast %18 : vector<1x32xf32> to vector<8x32xf32>
    %20 = arith.mulf %17, %19 : vector<8x32xf32>
    %c0_8 = arith.constant 0 : index
    %c0_9 = arith.constant 0 : index
    %21 = vector.load %arg4[%c0_8, %c0_9] : memref<1x32xf32, #tpu.memory_space<vmem>>, vector<1x32xf32>
    %22 = vector.broadcast %21 : vector<1x32xf32> to vector<8x32xf32>
    %23 = arith.addf %20, %22 : vector<8x32xf32>
    %24 = arith.truncf %23 : vector<8x32xf32> to vector<8x32xbf16>
    %c0_10 = arith.constant 0 : index
    %c0_11 = arith.constant 0 : index
    %25 = vector.load %arg5[%c0_10, %c0_11] : memref<32x32xbf16, #tpu.memory_space<vmem>>, vector<32x32xbf16>
    %cst_12 = arith.constant dense<0.000000e+00> : vector<8x32xf32>
    %26 = tpu.matmul %24, %25, %cst_12 {dimension_numbers = #tpu.dot_dimension_numbers<[1], [0], [0], [1], [0, 0, 1, 1], [], []>} : vector<8x32xbf16>, vector<32x32xbf16>, vector<8x32xf32> -> vector<8x32xf32>
    %c0_13 = arith.constant 0 : index
    %c0_14 = arith.constant 0 : index
    %27 = vector.load %arg6[%c0_13, %c0_14] : memref<1x32xf32, #tpu.memory_space<vmem>>, vector<1x32xf32>
    %28 = vector.broadcast %27 : vector<1x32xf32> to vector<8x32xf32>
    %29 = arith.addf %26, %28 : vector<8x32xf32>
    %c0_15 = arith.constant 0 : index
    %c0_16 = arith.constant 0 : index
    %30 = vector.load %arg7[%c0_15, %c0_16] : memref<32x64xbf16, #tpu.memory_space<vmem>>, vector<32x64xbf16>
    %cst_17 = arith.constant dense<0.000000e+00> : vector<8x64xf32>
    %31 = tpu.matmul %24, %30, %cst_17 {dimension_numbers = #tpu.dot_dimension_numbers<[1], [0], [0], [1], [0, 0, 1, 1], [], []>} : vector<8x32xbf16>, vector<32x64xbf16>, vector<8x64xf32> -> vector<8x64xf32>
    %c0_18 = arith.constant 0 : index
    %c0_19 = arith.constant 0 : index
    %32 = vector.load %arg8[%c0_18, %c0_19] : memref<1x64xf32, #tpu.memory_space<vmem>>, vector<1x64xf32>
    %33 = vector.broadcast %32 : vector<1x64xf32> to vector<8x64xf32>
    %34 = arith.addf %31, %33 : vector<8x64xf32>
    %35 = arith.truncf %29 : vector<8x32xf32> to vector<8x32xbf16>
    %36 = arith.truncf %34 : vector<8x64xf32> to vector<8x64xbf16>
    %37 = vector.extract_strided_slice %35 {offsets = [0, 0], sizes = [8, 8], strides = [1, 1]} : vector<8x32xbf16> to vector<8x8xbf16>
    %38 = vector.extract_strided_slice %36 {offsets = [0, 0], sizes = [8, 8], strides = [1, 1]} : vector<8x64xbf16> to vector<8x8xbf16>
    %39 = vector.extract_strided_slice %36 {offsets = [0, 32], sizes = [8, 8], strides = [1, 1]} : vector<8x64xbf16> to vector<8x8xbf16>
    %cst_20 = arith.constant dense<0.000000e+00> : vector<8x8xf32>
    %40 = tpu.matmul %37, %38, %cst_20 {dimension_numbers = #tpu.dot_dimension_numbers<[1], [1], [0], [0], [0, 0, 1, 0], [], []>} : vector<8x8xbf16>, vector<8x8xbf16>, vector<8x8xf32> -> vector<8x8xf32>
    %cst_21 = arith.constant dense<0xFF800000> : vector<8xf32>
    %41 = vector.multi_reduction <maximumf>, %40, %cst_21 [1] : vector<8x8xf32> to vector<8xf32>
    %42 = vector.shape_cast %41 : vector<8xf32> to vector<8x1xf32>
    %43 = vector.broadcast %42 : vector<8x1xf32> to vector<8x8xf32>
    %44 = arith.subf %40, %43 : vector<8x8xf32>
    %45 = math.exp %44 : vector<8x8xf32>
    %cst_22 = arith.constant dense<0.000000e+00> : vector<8xf32>
    %46 = vector.multi_reduction <add>, %45, %cst_22 [1] : vector<8x8xf32> to vector<8xf32>
    %47 = vector.shape_cast %46 : vector<8xf32> to vector<8x1xf32>
    %48 = arith.truncf %45 : vector<8x8xf32> to vector<8x8xbf16>
    %cst_23 = arith.constant dense<0.000000e+00> : vector<8x8xf32>
    %49 = tpu.matmul %48, %39, %cst_23 {dimension_numbers = #tpu.dot_dimension_numbers<[1], [0], [0], [1], [0, 0, 1, 1], [], []>} : vector<8x8xbf16>, vector<8x8xbf16>, vector<8x8xf32> -> vector<8x8xf32>
    %50 = tpu.reciprocal %47 {approx = true} : vector<8x1xf32> -> vector<8x1xf32>
    %51 = vector.broadcast %50 : vector<8x1xf32> to vector<8x8xf32>
    %52 = arith.mulf %49, %51 : vector<8x8xf32>
    %53 = arith.truncf %52 : vector<8x8xf32> to vector<8x8xbf16>
    %c0_24 = arith.constant 0 : index
    %c0_25 = arith.constant 0 : index
    %54 = vector.load %arg12[%c0_24, %c0_25] : memref<8x32xbf16, #tpu.memory_space<vmem>>, vector<8x8xbf16>
    tpu.vector_store %arg12[%c0_24, %c0_25], %53 {strides = array<i32>} : memref<8x32xbf16, #tpu.memory_space<vmem>>, vector<8x8xbf16>,
    %55 = vector.extract_strided_slice %35 {offsets = [0, 8], sizes = [8, 8], strides = [1, 1]} : vector<8x32xbf16> to vector<8x8xbf16>
    %56 = vector.extract_strided_slice %36 {offsets = [0, 8], sizes = [8, 8], strides = [1, 1]} : vector<8x64xbf16> to vector<8x8xbf16>
    %57 = vector.extract_strided_slice %36 {offsets = [0, 40], sizes = [8, 8], strides = [1, 1]} : vector<8x64xbf16> to vector<8x8xbf16>
    %cst_26 = arith.constant dense<0.000000e+00> : vector<8x8xf32>
    %58 = tpu.matmul %55, %56, %cst_26 {dimension_numbers = #tpu.dot_dimension_numbers<[1], [1], [0], [0], [0, 0, 1, 0], [], []>} : vector<8x8xbf16>, vector<8x8xbf16>, vector<8x8xf32> -> vector<8x8xf32>
    %cst_27 = arith.constant dense<0xFF800000> : vector<8xf32>
    %59 = vector.multi_reduction <maximumf>, %58, %cst_27 [1] : vector<8x8xf32> to vector<8xf32>
    %60 = vector.shape_cast %59 : vector<8xf32> to vector<8x1xf32>
    %61 = vector.broadcast %60 : vector<8x1xf32> to vector<8x8xf32>
    %62 = arith.subf %58, %61 : vector<8x8xf32>
    %63 = math.exp %62 : vector<8x8xf32>
    %cst_28 = arith.constant dense<0.000000e+00> : vector<8xf32>
    %64 = vector.multi_reduction <add>, %63, %cst_28 [1] : vector<8x8xf32> to vector<8xf32>
    %65 = vector.shape_cast %64 : vector<8xf32> to vector<8x1xf32>
    %66 = arith.truncf %63 : vector<8x8xf32> to vector<8x8xbf16>
    %cst_29 = arith.constant dense<0.000000e+00> : vector<8x8xf32>
    %67 = tpu.matmul %66, %57, %cst_29 {dimension_numbers = #tpu.dot_dimension_numbers<[1], [0], [0], [1], [0, 0, 1, 1], [], []>} : vector<8x8xbf16>, vector<8x8xbf16>, vector<8x8xf32> -> vector<8x8xf32>
    %68 = tpu.reciprocal %65 {approx = true} : vector<8x1xf32> -> vector<8x1xf32>
    %69 = vector.broadcast %68 : vector<8x1xf32> to vector<8x8xf32>
    %70 = arith.mulf %67, %69 : vector<8x8xf32>
    %71 = arith.truncf %70 : vector<8x8xf32> to vector<8x8xbf16>
    %c0_30 = arith.constant 0 : index
    %c8 = arith.constant 8 : index
    %72 = vector.load %arg12[%c0_30, %c8] : memref<8x32xbf16, #tpu.memory_space<vmem>>, vector<8x8xbf16>
    tpu.vector_store %arg12[%c0_30, %c8], %71 {strides = array<i32>} : memref<8x32xbf16, #tpu.memory_space<vmem>>, vector<8x8xbf16>,
    %73 = vector.extract_strided_slice %35 {offsets = [0, 16], sizes = [8, 8], strides = [1, 1]} : vector<8x32xbf16> to vector<8x8xbf16>
    %74 = vector.extract_strided_slice %36 {offsets = [0, 16], sizes = [8, 8], strides = [1, 1]} : vector<8x64xbf16> to vector<8x8xbf16>
    %75 = vector.extract_strided_slice %36 {offsets = [0, 48], sizes = [8, 8], strides = [1, 1]} : vector<8x64xbf16> to vector<8x8xbf16>
    %cst_31 = arith.constant dense<0.000000e+00> : vector<8x8xf32>
    %76 = tpu.matmul %73, %74, %cst_31 {dimension_numbers = #tpu.dot_dimension_numbers<[1], [1], [0], [0], [0, 0, 1, 0], [], []>} : vector<8x8xbf16>, vector<8x8xbf16>, vector<8x8xf32> -> vector<8x8xf32>
    %cst_32 = arith.constant dense<0xFF800000> : vector<8xf32>
    %77 = vector.multi_reduction <maximumf>, %76, %cst_32 [1] : vector<8x8xf32> to vector<8xf32>
    %78 = vector.shape_cast %77 : vector<8xf32> to vector<8x1xf32>
    %79 = vector.broadcast %78 : vector<8x1xf32> to vector<8x8xf32>
    %80 = arith.subf %76, %79 : vector<8x8xf32>
    %81 = math.exp %80 : vector<8x8xf32>
    %cst_33 = arith.constant dense<0.000000e+00> : vector<8xf32>
    %82 = vector.multi_reduction <add>, %81, %cst_33 [1] : vector<8x8xf32> to vector<8xf32>
    %83 = vector.shape_cast %82 : vector<8xf32> to vector<8x1xf32>
    %84 = arith.truncf %81 : vector<8x8xf32> to vector<8x8xbf16>
    %cst_34 = arith.constant dense<0.000000e+00> : vector<8x8xf32>
    %85 = tpu.matmul %84, %75, %cst_34 {dimension_numbers = #tpu.dot_dimension_numbers<[1], [0], [0], [1], [0, 0, 1, 1], [], []>} : vector<8x8xbf16>, vector<8x8xbf16>, vector<8x8xf32> -> vector<8x8xf32>
    %86 = tpu.reciprocal %83 {approx = true} : vector<8x1xf32> -> vector<8x1xf32>
    %87 = vector.broadcast %86 : vector<8x1xf32> to vector<8x8xf32>
    %88 = arith.mulf %85, %87 : vector<8x8xf32>
    %89 = arith.truncf %88 : vector<8x8xf32> to vector<8x8xbf16>
    %c0_35 = arith.constant 0 : index
    %c16 = arith.constant 16 : index
    %90 = vector.load %arg12[%c0_35, %c16] : memref<8x32xbf16, #tpu.memory_space<vmem>>, vector<8x8xbf16>
    tpu.vector_store %arg12[%c0_35, %c16], %89 {strides = array<i32>} : memref<8x32xbf16, #tpu.memory_space<vmem>>, vector<8x8xbf16>,
    %91 = vector.extract_strided_slice %35 {offsets = [0, 24], sizes = [8, 8], strides = [1, 1]} : vector<8x32xbf16> to vector<8x8xbf16>
    %92 = vector.extract_strided_slice %36 {offsets = [0, 24], sizes = [8, 8], strides = [1, 1]} : vector<8x64xbf16> to vector<8x8xbf16>
    %93 = vector.extract_strided_slice %36 {offsets = [0, 56], sizes = [8, 8], strides = [1, 1]} : vector<8x64xbf16> to vector<8x8xbf16>
    %cst_36 = arith.constant dense<0.000000e+00> : vector<8x8xf32>
    %94 = tpu.matmul %91, %92, %cst_36 {dimension_numbers = #tpu.dot_dimension_numbers<[1], [1], [0], [0], [0, 0, 1, 0], [], []>} : vector<8x8xbf16>, vector<8x8xbf16>, vector<8x8xf32> -> vector<8x8xf32>
    %cst_37 = arith.constant dense<0xFF800000> : vector<8xf32>
    %95 = vector.multi_reduction <maximumf>, %94, %cst_37 [1] : vector<8x8xf32> to vector<8xf32>
    %96 = vector.shape_cast %95 : vector<8xf32> to vector<8x1xf32>
    %97 = vector.broadcast %96 : vector<8x1xf32> to vector<8x8xf32>
    %98 = arith.subf %94, %97 : vector<8x8xf32>
    %99 = math.exp %98 : vector<8x8xf32>
    %cst_38 = arith.constant dense<0.000000e+00> : vector<8xf32>
    %100 = vector.multi_reduction <add>, %99, %cst_38 [1] : vector<8x8xf32> to vector<8xf32>
    %101 = vector.shape_cast %100 : vector<8xf32> to vector<8x1xf32>
    %102 = arith.truncf %99 : vector<8x8xf32> to vector<8x8xbf16>
    %cst_39 = arith.constant dense<0.000000e+00> : vector<8x8xf32>
    %103 = tpu.matmul %102, %93, %cst_39 {dimension_numbers = #tpu.dot_dimension_numbers<[1], [0], [0], [1], [0, 0, 1, 1], [], []>} : vector<8x8xbf16>, vector<8x8xbf16>, vector<8x8xf32> -> vector<8x8xf32>
    %104 = tpu.reciprocal %101 {approx = true} : vector<8x1xf32> -> vector<8x1xf32>
    %105 = vector.broadcast %104 : vector<8x1xf32> to vector<8x8xf32>
    %106 = arith.mulf %103, %105 : vector<8x8xf32>
    %107 = arith.truncf %106 : vector<8x8xf32> to vector<8x8xbf16>
    %c0_40 = arith.constant 0 : index
    %c24 = arith.constant 24 : index
    %108 = vector.load %arg12[%c0_40, %c24] : memref<8x32xbf16, #tpu.memory_space<vmem>>, vector<8x8xbf16>
    tpu.vector_store %arg12[%c0_40, %c24], %107 {strides = array<i32>} : memref<8x32xbf16, #tpu.memory_space<vmem>>, vector<8x8xbf16>,
    %c0_41 = arith.constant 0 : index
    %c0_42 = arith.constant 0 : index
    %109 = vector.load %arg12[%c0_41, %c0_42] : memref<8x32xbf16, #tpu.memory_space<vmem>>, vector<8x32xbf16>
    %c0_43 = arith.constant 0 : index
    %c0_44 = arith.constant 0 : index
    %110 = vector.load %arg9[%c0_43, %c0_44] : memref<32x32xbf16, #tpu.memory_space<vmem>>, vector<32x32xbf16>
    %cst_45 = arith.constant dense<0.000000e+00> : vector<8x32xf32>
    %111 = tpu.matmul %109, %110, %cst_45 {dimension_numbers = #tpu.dot_dimension_numbers<[1], [0], [0], [1], [0, 0, 1, 1], [], []>} : vector<8x32xbf16>, vector<32x32xbf16>, vector<8x32xf32> -> vector<8x32xf32>
    %c0_46 = arith.constant 0 : index
    %c0_47 = arith.constant 0 : index
    %112 = vector.load %arg10[%c0_46, %c0_47] : memref<1x32xf32, #tpu.memory_space<vmem>>, vector<1x32xf32>
    %113 = vector.broadcast %112 : vector<1x32xf32> to vector<8x32xf32>
    %114 = arith.addf %111, %113 : vector<8x32xf32>
    %115 = arith.addf %114, %1 : vector<8x32xf32>
    %c0_48 = arith.constant 0 : index
    %c0_49 = arith.constant 0 : index
    %c0_50 = arith.constant 0 : index
    %116 = vector.load %arg11[%c0_48, %c0_49, %c0_50] : memref<1x8x32xf32, #tpu.memory_space<vmem>>, vector<1x8x32xf32>
    %117 = vector.shape_cast %116 : vector<1x8x32xf32> to vector<8x32xf32>
    %118 = vector.shape_cast %115 : vector<8x32xf32> to vector<1x8x32xf32>
    tpu.vector_store %arg11[%c0_48, %c0_49, %c0_50], %118 {strides = array<i32>} : memref<1x8x32xf32, #tpu.memory_space<vmem>>, vector<1x8x32xf32>,
    return
  }
  func.func @transform_0(%arg0: i32, %arg1: i32) -> (i32, i32, i32) {
    %c0_i32 = arith.constant 0 : i32
    %c0_i32_0 = arith.constant 0 : i32
    %c0_i32_1 = arith.constant 0 : i32
    return %arg0, %c0_i32, %c0_i32_0 : i32, i32, i32
  }
  func.func @transform_1(%arg0: i32, %arg1: i32) -> (i32, i32) {
    %c0_i32 = arith.constant 0 : i32
    %c0_i32_0 = arith.constant 0 : i32
    %c0_i32_1 = arith.constant 0 : i32
    return %c0_i32, %c0_i32_0 : i32, i32
  }
  func.func @transform_2(%arg0: i32, %arg1: i32) -> (i32, i32) {
    %c0_i32 = arith.constant 0 : i32
    %c0_i32_0 = arith.constant 0 : i32
    %c0_i32_1 = arith.constant 0 : i32
    return %c0_i32, %c0_i32_0 : i32, i32
  }
  func.func @transform_3(%arg0: i32, %arg1: i32) -> (i32, i32) {
    %c0_i32 = arith.constant 0 : i32
    %c0_i32_0 = arith.constant 0 : i32
    %c0_i32_1 = arith.constant 0 : i32
    return %c0_i32, %c0_i32_0 : i32, i32
  }
  func.func @transform_4(%arg0: i32, %arg1: i32) -> (i32, i32) {
    %c0_i32 = arith.constant 0 : i32
    %c0_i32_0 = arith.constant 0 : i32
    %c0_i32_1 = arith.constant 0 : i32
    return %c0_i32, %c0_i32_0 : i32, i32
  }
  func.func @transform_5(%arg0: i32, %arg1: i32) -> (i32, i32) {
    %c0_i32 = arith.constant 0 : i32
    %c0_i32_0 = arith.constant 0 : i32
    %c0_i32_1 = arith.constant 0 : i32
    return %c0_i32, %c0_i32_0 : i32, i32
  }
  func.func @transform_6(%arg0: i32, %arg1: i32) -> (i32, i32) {
    %c0_i32 = arith.constant 0 : i32
    %c0_i32_0 = arith.constant 0 : i32
    %c0_i32_1 = arith.constant 0 : i32
    return %c0_i32, %c0_i32_0 : i32, i32
  }
  func.func @transform_7(%arg0: i32, %arg1: i32) -> (i32, i32) {
    %c0_i32 = arith.constant 0 : i32
    %c0_i32_0 = arith.constant 0 : i32
    %c0_i32_1 = arith.constant 0 : i32
    return %c0_i32, %c0_i32_0 : i32, i32
  }
  func.func @transform_8(%arg0: i32, %arg1: i32) -> (i32, i32) {
    %c0_i32 = arith.constant 0 : i32
    %c0_i32_0 = arith.constant 0 : i32
    %c0_i32_1 = arith.constant 0 : i32
    return %c0_i32, %c0_i32_0 : i32, i32
  }
  func.func @transform_9(%arg0: i32, %arg1: i32) -> (i32, i32, i32) {
    %c0_i32 = arith.constant 0 : i32
    %c0_i32_0 = arith.constant 0 : i32
    return %arg0, %arg1, %c0_i32 : i32, i32, i32
  }
}

module attributes {stable_mosaic.version = 11 : i64} {
  func.func @self_attention_kernel(%arg0: i32, %arg1: i32, %arg2: memref<1x8x32xf32, #tpu.memory_space<vmem>>, %arg3: memref<1x32xf32, #tpu.memory_space<vmem>>, %arg4: memref<1x32xf32, #tpu.memory_space<vmem>>, %arg5: memref<32x32xbf16, #tpu.memory_space<vmem>>, %arg6: memref<1x32xf32, #tpu.memory_space<vmem>>, %arg7: memref<32x64xbf16, #tpu.memory_space<vmem>>, %arg8: memref<1x64xf32, #tpu.memory_space<vmem>>, %arg9: memref<32x32xbf16, #tpu.memory_space<vmem>>, %arg10: memref<1x32xf32, #tpu.memory_space<vmem>>, %arg11: memref<1x8x32xf32, #tpu.memory_space<vmem>>, %arg12: memref<8x32xbf16, #tpu.memory_space<vmem>>) attributes {dimension_semantics = [#tpu.dimension_semantics<parallel>, #tpu.dimension_semantics<parallel>], iteration_bounds = array<i64: 2, 1>, scalar_prefetch = 0 : i64, scratch_operands = 1 : i64, tpu.core_type = #tpu.core_type<tc>, window_params = [{transform_indices = @transform_0, window_bounds = array<i64: 1, 8, 32>}, {pipeline_mode = #tpu.pipeline_mode<synchronous>, transform_indices = @transform_1, window_bounds = array<i64: 1, 32>}, {pipeline_mode = #tpu.pipeline_mode<synchronous>, transform_indices = @transform_2, window_bounds = array<i64: 1, 32>}, {pipeline_mode = #tpu.pipeline_mode<synchronous>, transform_indices = @transform_3, window_bounds = array<i64: 32, 32>}, {pipeline_mode = #tpu.pipeline_mode<synchronous>, transform_indices = @transform_4, window_bounds = array<i64: 1, 32>}, {pipeline_mode = #tpu.pipeline_mode<synchronous>, transform_indices = @transform_5, window_bounds = array<i64: 32, 64>}, {pipeline_mode = #tpu.pipeline_mode<synchronous>, transform_indices = @transform_6, window_bounds = array<i64: 1, 64>}, {pipeline_mode = #tpu.pipeline_mode<synchronous>, transform_indices = @transform_7, window_bounds = array<i64: 32, 32>}, {pipeline_mode = #tpu.pipeline_mode<synchronous>, transform_indices = @transform_8, window_bounds = array<i64: 1, 32>}, {transform_indices = @transform_9, window_bounds = array<i64: 1, 8, 32>}]} {
    %c0 = arith.constant 0 : index
    %c0_0 = arith.constant 0 : index
    %c0_1 = arith.constant 0 : index
    %0 = vector.load %arg2[%c0, %c0_0, %c0_1] : memref<1x8x32xf32, #tpu.memory_space<vmem>>, vector<1x8x32xf32>
    %1 = vector.shape_cast %0 : vector<1x8x32xf32> to vector<8x32xf32>
    %cst = arith.constant dense<0.000000e+00> : vector<8xf32>
    %2 = vector.multi_reduction <add>, %1, %cst [1] : vector<8x32xf32> to vector<8xf32>
    %3 = vector.shape_cast %2 : vector<8xf32> to vector<8x1xf32>
    %cst_2 = arith.constant 3.200000e+01 : f32
    %4 = vector.broadcast %cst_2 : f32 to vector<8x1xf32>
    %5 = arith.divf %3, %4 : vector<8x1xf32>
    %6 = vector.broadcast %5 : vector<8x1xf32> to vector<8x32xf32>
    %7 = arith.subf %1, %6 : vector<8x32xf32>
    %8 = arith.mulf %7, %7 : vector<8x32xf32>
    %cst_3 = arith.constant dense<0.000000e+00> : vector<8xf32>
    %9 = vector.multi_reduction <add>, %8, %cst_3 [1] : vector<8x32xf32> to vector<8xf32>
    %10 = vector.shape_cast %9 : vector<8xf32> to vector<8x1xf32>
    %cst_4 = arith.constant 3.200000e+01 : f32
    %11 = vector.broadcast %cst_4 : f32 to vector<8x1xf32>
    %12 = arith.divf %10, %11 : vector<8x1xf32>
    %cst_5 = arith.constant 9.99999974E-6 : f32
    %13 = vector.broadcast %cst_5 : f32 to vector<8x1xf32>
    %14 = arith.addf %12, %13 : vector<8x1xf32>
    %15 = math.rsqrt %14 : vector<8x1xf32>
    %16 = vector.broadcast %15 : vector<8x1xf32> to vector<8x32xf32>
    %17 = arith.mulf %7, %16 : vector<8x32xf32>
    %c0_6 = arith.constant 0 : index
    %c0_7 = arith.constant 0 : index
    %18 = vector.load %arg3[%c0_6, %c0_7] : memref<1x32xf32, #tpu.memory_space<vmem>>, vector<1x32xf32>
    %19 = vector.broadcast %18 : vector<1x32xf32> to vector<8x32xf32>
    %20 = arith.mulf %17, %19 : vector<8x32xf32>
    %c0_8 = arith.constant 0 : index
    %c0_9 = arith.constant 0 : index
    %21 = vector.load %arg4[%c0_8, %c0_9] : memref<1x32xf32, #tpu.memory_space<vmem>>, vector<1x32xf32>
    %22 = vector.broadcast %21 : vector<1x32xf32> to vector<8x32xf32>
    %23 = arith.addf %20, %22 : vector<8x32xf32>
    %24 = arith.truncf %23 : vector<8x32xf32> to vector<8x32xbf16>
    %c0_10 = arith.constant 0 : index
    %c0_11 = arith.constant 0 : index
    %25 = vector.load %arg5[%c0_10, %c0_11] : memref<32x32xbf16, #tpu.memory_space<vmem>>, vector<32x32xbf16>
    %cst_12 = arith.constant dense<0.000000e+00> : vector<8x32xf32>
    %26 = tpu.matmul %24, %25, %cst_12 {dimension_numbers = #tpu.dot_dimension_numbers<[1], [0], [0], [1], [0, 0, 1, 1], [], []>} : vector<8x32xbf16>, vector<32x32xbf16>, vector<8x32xf32> -> vector<8x32xf32>
    %c0_13 = arith.constant 0 : index
    %c0_14 = arith.constant 0 : index
    %27 = vector.load %arg6[%c0_13, %c0_14] : memref<1x32xf32, #tpu.memory_space<vmem>>, vector<1x32xf32>
    %28 = vector.broadcast %27 : vector<1x32xf32> to vector<8x32xf32>
    %29 = arith.addf %26, %28 : vector<8x32xf32>
    %c0_15 = arith.constant 0 : index
    %c0_16 = arith.constant 0 : index
    %30 = vector.load %arg7[%c0_15, %c0_16] : memref<32x64xbf16, #tpu.memory_space<vmem>>, vector<32x64xbf16>
    %cst_17 = arith.constant dense<0.000000e+00> : vector<8x64xf32>
    %31 = tpu.matmul %24, %30, %cst_17 {dimension_numbers = #tpu.dot_dimension_numbers<[1], [0], [0], [1], [0, 0, 1, 1], [], []>} : vector<8x32xbf16>, vector<32x64xbf16>, vector<8x64xf32> -> vector<8x64xf32>
    %c0_18 = arith.constant 0 : index
    %c0_19 = arith.constant 0 : index
    %32 = vector.load %arg8[%c0_18, %c0_19] : memref<1x64xf32, #tpu.memory_space<vmem>>, vector<1x64xf32>
    %33 = vector.broadcast %32 : vector<1x64xf32> to vector<8x64xf32>
    %34 = arith.addf %31, %33 : vector<8x64xf32>
    %35 = arith.truncf %29 : vector<8x32xf32> to vector<8x32xbf16>
    %36 = arith.truncf %34 : vector<8x64xf32> to vector<8x64xbf16>
    %37 = vector.extract_strided_slice %35 {offsets = [0, 0], sizes = [8, 8], strides = [1, 1]} : vector<8x32xbf16> to vector<8x8xbf16>
    %38 = vector.extract_strided_slice %36 {offsets = [0, 0], sizes = [8, 8], strides = [1, 1]} : vector<8x64xbf16> to vector<8x8xbf16>
    %39 = vector.extract_strided_slice %36 {offsets = [0, 32], sizes = [8, 8], strides = [1, 1]} : vector<8x64xbf16> to vector<8x8xbf16>
    %cst_20 = arith.constant dense<0.000000e+00> : vector<8x8xf32>
    %40 = tpu.matmul %37, %38, %cst_20 {dimension_numbers = #tpu.dot_dimension_numbers<[1], [1], [0], [0], [0, 0, 1, 0], [], []>} : vector<8x8xbf16>, vector<8x8xbf16>, vector<8x8xf32> -> vector<8x8xf32>
    %cst_21 = arith.constant dense<0xFF800000> : vector<8xf32>
    %41 = vector.multi_reduction <maximumf>, %40, %cst_21 [1] : vector<8x8xf32> to vector<8xf32>
    %42 = vector.shape_cast %41 : vector<8xf32> to vector<8x1xf32>
    %43 = vector.broadcast %42 : vector<8x1xf32> to vector<8x8xf32>
    %44 = arith.subf %40, %43 : vector<8x8xf32>
    %45 = math.exp %44 : vector<8x8xf32>
    %cst_22 = arith.constant dense<0.000000e+00> : vector<8xf32>
    %46 = vector.multi_reduction <add>, %45, %cst_22 [1] : vector<8x8xf32> to vector<8xf32>
    %47 = vector.shape_cast %46 : vector<8xf32> to vector<8x1xf32>
    %48 = arith.truncf %45 : vector<8x8xf32> to vector<8x8xbf16>
    %cst_23 = arith.constant dense<0.000000e+00> : vector<8x8xf32>
    %49 = tpu.matmul %48, %39, %cst_23 {dimension_numbers = #tpu.dot_dimension_numbers<[1], [0], [0], [1], [0, 0, 1, 1], [], []>} : vector<8x8xbf16>, vector<8x8xbf16>, vector<8x8xf32> -> vector<8x8xf32>
    %50 = tpu.reciprocal %47 {approx = true} : vector<8x1xf32> -> vector<8x1xf32>
    %51 = vector.broadcast %50 : vector<8x1xf32> to vector<8x8xf32>
    %52 = arith.mulf %49, %51 : vector<8x8xf32>
    %53 = arith.truncf %52 : vector<8x8xf32> to vector<8x8xbf16>
    %c0_24 = arith.constant 0 : index
    %c0_25 = arith.constant 0 : index
    %54 = vector.load %arg12[%c0_24, %c0_25] : memref<8x32xbf16, #tpu.memory_space<vmem>>, vector<8x8xbf16>
    tpu.vector_store %arg12[%c0_24, %c0_25], %53 {strides = array<i32>} : memref<8x32xbf16, #tpu.memory_space<vmem>>, vector<8x8xbf16>,
    %55 = vector.extract_strided_slice %35 {offsets = [0, 8], sizes = [8, 8], strides = [1, 1]} : vector<8x32xbf16> to vector<8x8xbf16>
    %56 = vector.extract_strided_slice %36 {offsets = [0, 8], sizes = [8, 8], strides = [1, 1]} : vector<8x64xbf16> to vector<8x8xbf16>
    %57 = vector.extract_strided_slice %36 {offsets = [0, 40], sizes = [8, 8], strides = [1, 1]} : vector<8x64xbf16> to vector<8x8xbf16>
    %cst_26 = arith.constant dense<0.000000e+00> : vector<8x8xf32>
    %58 = tpu.matmul %55, %56, %cst_26 {dimension_numbers = #tpu.dot_dimension_numbers<[1], [1], [0], [0], [0, 0, 1, 0], [], []>} : vector<8x8xbf16>, vector<8x8xbf16>, vector<8x8xf32> -> vector<8x8xf32>
    %cst_27 = arith.constant dense<0xFF800000> : vector<8xf32>
    %59 = vector.multi_reduction <maximumf>, %58, %cst_27 [1] : vector<8x8xf32> to vector<8xf32>
    %60 = vector.shape_cast %59 : vector<8xf32> to vector<8x1xf32>
    %61 = vector.broadcast %60 : vector<8x1xf32> to vector<8x8xf32>
    %62 = arith.subf %58, %61 : vector<8x8xf32>
    %63 = math.exp %62 : vector<8x8xf32>
    %cst_28 = arith.constant dense<0.000000e+00> : vector<8xf32>
    %64 = vector.multi_reduction <add>, %63, %cst_28 [1] : vector<8x8xf32> to vector<8xf32>
    %65 = vector.shape_cast %64 : vector<8xf32> to vector<8x1xf32>
    %66 = arith.truncf %63 : vector<8x8xf32> to vector<8x8xbf16>
    %cst_29 = arith.constant dense<0.000000e+00> : vector<8x8xf32>
    %67 = tpu.matmul %66, %57, %cst_29 {dimension_numbers = #tpu.dot_dimension_numbers<[1], [0], [0], [1], [0, 0, 1, 1], [], []>} : vector<8x8xbf16>, vector<8x8xbf16>, vector<8x8xf32> -> vector<8x8xf32>
    %68 = tpu.reciprocal %65 {approx = true} : vector<8x1xf32> -> vector<8x1xf32>
    %69 = vector.broadcast %68 : vector<8x1xf32> to vector<8x8xf32>
    %70 = arith.mulf %67, %69 : vector<8x8xf32>
    %71 = arith.truncf %70 : vector<8x8xf32> to vector<8x8xbf16>
    %c0_30 = arith.constant 0 : index
    %c8 = arith.constant 8 : index
    %72 = vector.load %arg12[%c0_30, %c8] : memref<8x32xbf16, #tpu.memory_space<vmem>>, vector<8x8xbf16>
    tpu.vector_store %arg12[%c0_30, %c8], %71 {strides = array<i32>} : memref<8x32xbf16, #tpu.memory_space<vmem>>, vector<8x8xbf16>,
    %73 = vector.extract_strided_slice %35 {offsets = [0, 16], sizes = [8, 8], strides = [1, 1]} : vector<8x32xbf16> to vector<8x8xbf16>
    %74 = vector.extract_strided_slice %36 {offsets = [0, 16], sizes = [8, 8], strides = [1, 1]} : vector<8x64xbf16> to vector<8x8xbf16>
    %75 = vector.extract_strided_slice %36 {offsets = [0, 48], sizes = [8, 8], strides = [1, 1]} : vector<8x64xbf16> to vector<8x8xbf16>
    %cst_31 = arith.constant dense<0.000000e+00> : vector<8x8xf32>
    %76 = tpu.matmul %73, %74, %cst_31 {dimension_numbers = #tpu.dot_dimension_numbers<[1], [1], [0], [0], [0, 0, 1, 0], [], []>} : vector<8x8xbf16>, vector<8x8xbf16>, vector<8x8xf32> -> vector<8x8xf32>
    %cst_32 = arith.constant dense<0xFF800000> : vector<8xf32>
    %77 = vector.multi_reduction <maximumf>, %76, %cst_32 [1] : vector<8x8xf32> to vector<8xf32>
    %78 = vector.shape_cast %77 : vector<8xf32> to vector<8x1xf32>
    %79 = vector.broadcast %78 : vector<8x1xf32> to vector<8x8xf32>
    %80 = arith.subf %76, %79 : vector<8x8xf32>
    %81 = math.exp %80 : vector<8x8xf32>
    %cst_33 = arith.constant dense<0.000000e+00> : vector<8xf32>
    %82 = vector.multi_reduction <add>, %81, %cst_33 [1] : vector<8x8xf32> to vector<8xf32>
    %83 = vector.shape_cast %82 : vector<8xf32> to vector<8x1xf32>
    %84 = arith.truncf %81 : vector<8x8xf32> to vector<8x8xbf16>
    %cst_34 = arith.constant dense<0.000000e+00> : vector<8x8xf32>
    %85 = tpu.matmul %84, %75, %cst_34 {dimension_numbers = #tpu.dot_dimension_numbers<[1], [0], [0], [1], [0, 0, 1, 1], [], []>} : vector<8x8xbf16>, vector<8x8xbf16>, vector<8x8xf32> -> vector<8x8xf32>
    %86 = tpu.reciprocal %83 {approx = true} : vector<8x1xf32> -> vector<8x1xf32>
    %87 = vector.broadcast %86 : vector<8x1xf32> to vector<8x8xf32>
    %88 = arith.mulf %85, %87 : vector<8x8xf32>
    %89 = arith.truncf %88 : vector<8x8xf32> to vector<8x8xbf16>
    %c0_35 = arith.constant 0 : index
    %c16 = arith.constant 16 : index
    %90 = vector.load %arg12[%c0_35, %c16] : memref<8x32xbf16, #tpu.memory_space<vmem>>, vector<8x8xbf16>
    tpu.vector_store %arg12[%c0_35, %c16], %89 {strides = array<i32>} : memref<8x32xbf16, #tpu.memory_space<vmem>>, vector<8x8xbf16>,
    %91 = vector.extract_strided_slice %35 {offsets = [0, 24], sizes = [8, 8], strides = [1, 1]} : vector<8x32xbf16> to vector<8x8xbf16>
    %92 = vector.extract_strided_slice %36 {offsets = [0, 24], sizes = [8, 8], strides = [1, 1]} : vector<8x64xbf16> to vector<8x8xbf16>
    %93 = vector.extract_strided_slice %36 {offsets = [0, 56], sizes = [8, 8], strides = [1, 1]} : vector<8x64xbf16> to vector<8x8xbf16>
    %cst_36 = arith.constant dense<0.000000e+00> : vector<8x8xf32>
    %94 = tpu.matmul %91, %92, %cst_36 {dimension_numbers = #tpu.dot_dimension_numbers<[1], [1], [0], [0], [0, 0, 1, 0], [], []>} : vector<8x8xbf16>, vector<8x8xbf16>, vector<8x8xf32> -> vector<8x8xf32>
    %cst_37 = arith.constant dense<0xFF800000> : vector<8xf32>
    %95 = vector.multi_reduction <maximumf>, %94, %cst_37 [1] : vector<8x8xf32> to vector<8xf32>
    %96 = vector.shape_cast %95 : vector<8xf32> to vector<8x1xf32>
    %97 = vector.broadcast %96 : vector<8x1xf32> to vector<8x8xf32>
    %98 = arith.subf %94, %97 : vector<8x8xf32>
    %99 = math.exp %98 : vector<8x8xf32>
    %cst_38 = arith.constant dense<0.000000e+00> : vector<8xf32>
    %100 = vector.multi_reduction <add>, %99, %cst_38 [1] : vector<8x8xf32> to vector<8xf32>
    %101 = vector.shape_cast %100 : vector<8xf32> to vector<8x1xf32>
    %102 = arith.truncf %99 : vector<8x8xf32> to vector<8x8xbf16>
    %cst_39 = arith.constant dense<0.000000e+00> : vector<8x8xf32>
    %103 = tpu.matmul %102, %93, %cst_39 {dimension_numbers = #tpu.dot_dimension_numbers<[1], [0], [0], [1], [0, 0, 1, 1], [], []>} : vector<8x8xbf16>, vector<8x8xbf16>, vector<8x8xf32> -> vector<8x8xf32>
    %104 = tpu.reciprocal %101 {approx = true} : vector<8x1xf32> -> vector<8x1xf32>
    %105 = vector.broadcast %104 : vector<8x1xf32> to vector<8x8xf32>
    %106 = arith.mulf %103, %105 : vector<8x8xf32>
    %107 = arith.truncf %106 : vector<8x8xf32> to vector<8x8xbf16>
    %c0_40 = arith.constant 0 : index
    %c24 = arith.constant 24 : index
    %108 = vector.load %arg12[%c0_40, %c24] : memref<8x32xbf16, #tpu.memory_space<vmem>>, vector<8x8xbf16>
    tpu.vector_store %arg12[%c0_40, %c24], %107 {strides = array<i32>} : memref<8x32xbf16, #tpu.memory_space<vmem>>, vector<8x8xbf16>,
    %c0_41 = arith.constant 0 : index
    %c0_42 = arith.constant 0 : index
    %109 = vector.load %arg12[%c0_41, %c0_42] : memref<8x32xbf16, #tpu.memory_space<vmem>>, vector<8x32xbf16>
    %c0_43 = arith.constant 0 : index
    %c0_44 = arith.constant 0 : index
    %110 = vector.load %arg9[%c0_43, %c0_44] : memref<32x32xbf16, #tpu.memory_space<vmem>>, vector<32x32xbf16>
    %cst_45 = arith.constant dense<0.000000e+00> : vector<8x32xf32>
    %111 = tpu.matmul %109, %110, %cst_45 {dimension_numbers = #tpu.dot_dimension_numbers<[1], [0], [0], [1], [0, 0, 1, 1], [], []>} : vector<8x32xbf16>, vector<32x32xbf16>, vector<8x32xf32> -> vector<8x32xf32>
    %c0_46 = arith.constant 0 : index
    %c0_47 = arith.constant 0 : index
    %112 = vector.load %arg10[%c0_46, %c0_47] : memref<1x32xf32, #tpu.memory_space<vmem>>, vector<1x32xf32>
    %113 = vector.broadcast %112 : vector<1x32xf32> to vector<8x32xf32>
    %114 = arith.addf %111, %113 : vector<8x32xf32>
    %115 = arith.addf %114, %1 : vector<8x32xf32>
    %c0_48 = arith.constant 0 : index
    %c0_49 = arith.constant 0 : index
    %c0_50 = arith.constant 0 : index
    %116 = vector.load %arg11[%c0_48, %c0_49, %c0_50] : memref<1x8x32xf32, #tpu.memory_space<vmem>>, vector<1x8x32xf32>
    %117 = vector.shape_cast %116 : vector<1x8x32xf32> to vector<8x32xf32>
    %118 = vector.shape_cast %115 : vector<8x32xf32> to vector<1x8x32xf32>
    tpu.vector_store %arg11[%c0_48, %c0_49, %c0_50], %118 {strides = array<i32>} : memref<1x8x32xf32, #tpu.memory_space<vmem>>, vector<1x8x32xf32>,
    return
  }
  func.func @transform_0(%arg0: i32, %arg1: i32) -> (i32, i32, i32) {
    %c0_i32 = arith.constant 0 : i32
    %c0_i32_0 = arith.constant 0 : i32
    %c0_i32_1 = arith.constant 0 : i32
    return %arg0, %c0_i32, %c0_i32_0 : i32, i32, i32
  }
  func.func @transform_1(%arg0: i32, %arg1: i32) -> (i32, i32) {
    %c0_i32 = arith.constant 0 : i32
    %c0_i32_0 = arith.constant 0 : i32
    %c0_i32_1 = arith.constant 0 : i32
    return %c0_i32, %c0_i32_0 : i32, i32
  }
  func.func @transform_2(%arg0: i32, %arg1: i32) -> (i32, i32) {
    %c0_i32 = arith.constant 0 : i32
    %c0_i32_0 = arith.constant 0 : i32
    %c0_i32_1 = arith.constant 0 : i32
    return %c0_i32, %c0_i32_0 : i32, i32
  }
  func.func @transform_3(%arg0: i32, %arg1: i32) -> (i32, i32) {
    %c0_i32 = arith.constant 0 : i32
    %c0_i32_0 = arith.constant 0 : i32
    %c0_i32_1 = arith.constant 0 : i32
    return %c0_i32, %c0_i32_0 : i32, i32
  }
  func.func @transform_4(%arg0: i32, %arg1: i32) -> (i32, i32) {
    %c0_i32 = arith.constant 0 : i32
    %c0_i32_0 = arith.constant 0 : i32
    %c0_i32_1 = arith.constant 0 : i32
    return %c0_i32, %c0_i32_0 : i32, i32
  }
  func.func @transform_5(%arg0: i32, %arg1: i32) -> (i32, i32) {
    %c0_i32 = arith.constant 0 : i32
    %c0_i32_0 = arith.constant 0 : i32
    %c0_i32_1 = arith.constant 0 : i32
    return %c0_i32, %c0_i32_0 : i32, i32
  }
  func.func @transform_6(%arg0: i32, %arg1: i32) -> (i32, i32) {
    %c0_i32 = arith.constant 0 : i32
    %c0_i32_0 = arith.constant 0 : i32
    %c0_i32_1 = arith.constant 0 : i32
    return %c0_i32, %c0_i32_0 : i32, i32
  }
  func.func @transform_7(%arg0: i32, %arg1: i32) -> (i32, i32) {
    %c0_i32 = arith.constant 0 : i32
    %c0_i32_0 = arith.constant 0 : i32
    %c0_i32_1 = arith.constant 0 : i32
    return %c0_i32, %c0_i32_0 : i32, i32
  }
  func.func @transform_8(%arg0: i32, %arg1: i32) -> (i32, i32) {
    %c0_i32 = arith.constant 0 : i32
    %c0_i32_0 = arith.constant 0 : i32
    %c0_i32_1 = arith.constant 0 : i32
    return %c0_i32, %c0_i32_0 : i32, i32
  }
  func.func @transform_9(%arg0: i32, %arg1: i32) -> (i32, i32, i32) {
    %c0_i32 = arith.constant 0 : i32
    %c0_i32_0 = arith.constant 0 : i32
    return %arg0, %arg1, %c0_i32 : i32, i32, i32
  }
}

</mosaic_0001>

<bundles_post_ra>
// kernel: tpu_custom_call.1
= control target key start
LH: loop header
LB: loop body
LE: loop exit
PB: predicated region body
PF: predicated region fallthrough
CT: control target
= control target key end

     0   :  { %s1705_s0 = inlined_call_operand.hbm [shape: f32[2,8,32], index: 0, kind: input, shape index: {}]   ;;  %s1706_s1 = inlined_call_operand.hbm [shape: f32[1,32], index: 1, kind: input, shape index: {}]   ;;  %s1707_s2 = inlined_call_operand.vmem [shape: f32[1,32], index: 2, kind: input, shape index: {}]   ;;  %s1708_s3 = inlined_call_operand.hbm [shape: bf16[32,32], index: 3, kind: input, shape index: {}]   ;;  %s1709_s4 = inlined_call_operand.vmem [shape: f32[1,32], index: 4, kind: input, shape index: {}]   ;;  %s1710_s5 = inlined_call_operand.hbm [shape: bf16[32,64], index: 5, kind: input, shape index: {}]   ;;  %s1711_s6 = inlined_call_operand.vmem [shape: f32[1,64], index: 6, kind: input, shape index: {}]   ;;  %s1712_s7 = inlined_call_operand.hbm [shape: bf16[32,32], index: 7, kind: input, shape index: {}]   ;;  %s1713_s8 = inlined_call_operand.vmem [shape: f32[1,32], index: 8, kind: input, shape index: {}]   ;;  %s1714_s9 = inlined_call_operand.hbm [shape: f32[2,8,32], index: 9, kind: output, shape index: {}]  }
   0x1   :  { %1716 = sst [smem:[#allocation17_spill]] %s1706_s1 }
   0x2   :  { %1717 = sst [smem:[#allocation18_spill]] %s1708_s3 }
   0x3   :  { %1718 = sst [smem:[#allocation19_spill]] %s1710_s5 }
   0x4   :  { %14 = vsyncpa [#allocation4], 0 }
   0x5   :  { %16 = vsyncpa [#allocation4 + $0x1], 0 }
   0x6   :  { %17 = vsyncpa [#allocation7], 0 }
   0x7   :  { %18 = vsyncpa [#allocation10], 0 }
   0x8   :  { %19 = vsyncpa [#allocation5], 0 }
   0x9   :  { %21 = vsyncpa [#allocation5 + $0x1], 0  ;;  %s1479_s30 = smov 0   ;;  %s1481_s10 = smov 0  }
   0xa   :  { %s1483_s11 = smov 0   ;;  %s1485_s12 = smov 0  }
   0xb   :  { %s1487_s13 = smov 0   ;;  %s1489_s14 = smov 0  }
   0xc LB: > { %s1715_s15 = sadd.s32 4294967295, %s1410_s14   ;;  %p969_p0 = scmp.ge.s32.totalorder %s1410_s14, 1  ;;  %s1410_s14 = sphi %s1489_s14, %s27_s14   ;;  %s1406_s13 = sphi %s1487_s13, %s1733_s13   ;;  %s1402_s12 = sphi %s1485_s12, %s1732_s12   ;;  %s1398_s11 = sphi %s1483_s11, %s1731_s11   ;;  %s1394_s10 = sphi %s1481_s10, %s1730_s10   ;;  %s1390_s30 = sphi %s1479_s30, %s1729_s30  }
   0xd   : > { %p1513_p1 = scmp.eq.s32.totalorder %s1715_s15, 0  ;;  %p266_p2 = scmp.lt.s32.totalorder %s1410_s14, 3 }
   0xe   : > { %s1720_s1 = sld [smem:[#allocation17_spill]]  ;;  %p974_p4 = scmp.ge.s32.totalorder %s1410_s14, 2 }
   0xf   : > { %p1521_p3 = pnand %p969_p0, %p266_p2  ;;  %s1412_s21 = smov [#allocation6]  }
  0x10   : > { %s280_s22 = sshll.u32 %s1412_s21, 4  ;;  %s1723_s5 = sld [smem:[#allocation19_spill]]  ;;  %s281_s22 = int_to_ptr.vmem [resolvable:$true] %s280_s22 }
  0x11   : > { %p1049_p5 = pneg %p1521_p3  ;;  %s1413_s27 = smov [#allocation9]  }
  0x12   : > { %s311_s28 = sshll.u32 %s1413_s27, 4  ;;  %s1724_s3 = sld [smem:[#allocation18_spill]]  ;;  %s312_s28 = int_to_ptr.vmem [resolvable:$true] %s311_s28 }
  0x13   : > { %p1530_p6 = pnand %p1049_p5, %p1513_p1  ;;  %s1414_s21 = smov 64  }
  0x14   : > { %s278_s19 = sshll.u32 %s1720_s1, 4  ;;  %s1415_s24 = smov 4   ;;  %s279_s19 = int_to_ptr.hbm [resolvable:$true] %s278_s19 }
  0x15   : > { %1052 = dma.hbm_to_vmem [thread:$0]  (!%p1530_p6), %s279_s19, 16, %s281_s22, [#allocation7]  }
  0x16   : > { %s309_s26 = sshll.u32 %s1723_s5, 4  ;;  %s326_s22 = sshll.u32 %s1712_s7, 4  ;;  %s310_s26 = int_to_ptr.hbm [resolvable:$true] %s309_s26  ;;  %s327_s22 = int_to_ptr.hbm [resolvable:$true] %s326_s22 }
  0x17   : > { %1058 = dma.hbm_to_vmem [thread:$0]  (!%p1530_p6), %s310_s26, 256, %s312_s28, [#allocation10], %s1414_s21, %s1414_s21, %s1415_s24  }
  0x18   : > { %s292_s18 = sshll.u32 %s1724_s3, 4  ;;  %s1416_s27 = smov [#allocation8]   ;;  %s293_s18 = int_to_ptr.hbm [resolvable:$true] %s292_s18 }
  0x19   : > { %s294_s29 = sshll.u32 %s1416_s27, 4  ;;  %s1417_s17 = smov [#allocation11]   ;;  %s295_s29 = int_to_ptr.vmem [resolvable:$true] %s294_s29 }
  0x1a   : > { %1055 = dma.hbm_to_vmem [thread:$0]  (!%p1530_p6), %s293_s18, 256, %s295_s29, [#allocation7], %s1414_s21, %s1414_s21, %s1415_s24  }
  0x1b   : > { %s328_s15 = sshll.u32 %s1417_s17, 4  ;;  %s39_s26 = sadd.s32 1, %s1406_s13  ;;  %s329_s15 = int_to_ptr.vmem [resolvable:$true] %s328_s15 }
  0x1c   : > { %1061 = dma.hbm_to_vmem [thread:$0]  (!%p1530_p6), %s327_s22, 256, %s329_s15, [#allocation10], %s1414_s21, %s1414_s21, %s1415_s24  }
  0x1d   : > { %s968_s28 = sadd.s32 4294967294, %s1410_s14   ;;  %p41_p7 = scmp.ge.s32.totalorder %s39_s26, 2 }
  0x1e   : > { %s46_s25 = sadd.s32 1, %s1398_s11  ;;  %p53_p8 = scmp.ne.s32.totalorder %s1398_s11, %s1394_s10 }
  0x1f   : > { %s1735_s26 = smov (%p41_p7, %s39_s26), 0  ;;  %p54_p9 = scmp.eq.s32.totalorder %s1410_s14, 0 }
  0x20   : > { %p59_p10 = scmp.ne.s32.totalorder %s1394_s10, %s1390_s30  ;;  %s43_s18 = ssub.s32 %s1406_s13, %s1735_s26 }
  0x21   : > { %s1725_s19 = sadd.s32 4294967295, %s1410_s14   ;;  %p44_p12 = scmp.eq.s32.totalorder %s43_s18, 0 }
  0x22   : > { %p253_p11 = scmp.eq.s32.totalorder %s1725_s19, 1  ;;  %p1567_p13 = por %p1513_p1, %p59_p10 }
  0x23   : > { %p259_p2 = scmp.eq.s32.totalorder %s968_s28, 1  ;;  %p55_p5 = por %p54_p9, %p53_p8 }
  0x24   : > { %p1571_p0 = por %p253_p11, %p53_p8  ;;  %s345_s22 = sand.u32 1, %s1398_s11  }
  0x25   : > { %s1576_s21 = scalar_select %p44_p12, %s1398_s11, %s46_s25  }
  0x26   : > { %p1578_p6 = por %p259_p2, %p59_p10  ;;  %s976_s27 = sshll.u32 %s1406_s13, 3 }
  0x27   : > { %p1074_p7 = scmp.lt.s32.totalorder %s1410_s14, 2  ;;  %s975_s29 = sshll.u32 %s345_s22, 3 }
  0x28   : > { %s353_s19 = scalar_lea.hbm %s1705_s0, %s976_s27  ;;  %s349_s3 = scalar_lea.vmem [#allocation3], %s975_s29 }
  0x29   : > { %s355_s1 = sshll.u32 %s353_s19, 4  ;;  %s357_s5 = sshll.u32 %s349_s3, 4  ;;  %s356_s1 = int_to_ptr.hbm [resolvable:$true] %s355_s1  ;;  %s358_s5 = int_to_ptr.vmem [resolvable:$true] %s357_s5 }
  0x2a   : > { %p1063_p11 = pnand %p1074_p7, %p55_p5  ;;  %s346_s28 = scalar_lea.sflag [#allocation4], %s345_s22 }
  0x2b   : > { %366 = sbr.rel (%p1521_p3) target bundleno = 1417 (0x589), region = 56  ;;  %s1591_s25 = sand.u32 (!%p1521_p3), 1, %s1394_s10  }
  0x2c   : > { %1065 = dma.hbm_to_vmem [thread:$0]  (!%p1063_p11), %s356_s1, 128, %s358_s5, %s346_s28  }
  0x2d   : > { %s978_s17 = sshll.u32 (!%p1521_p3), %s1591_s25, 3  ;;  %s369_s27 = scalar_lea.sflag (!%p1521_p3), [#allocation4], %s1591_s25 }
  0x2e   : > { %s372_s29 = scalar_lea.vmem (!%p1521_p3), [#allocation3], %s978_s17 }
  0x30   : > { %1373 = dma.done.wait (%p1567_p13), %s369_s27, 128  }
  0x31   : > { %1375 = vsyncadd (%p1567_p13), %s369_s27, 4294967168 }
  0x32   : > { %1377 = dma.done.wait (%p1513_p1), [#allocation7], 272  }
  0x33   : > { %1379 = vsyncadd (%p1513_p1), [#allocation7], 4294967024 }
  0x34   : > { %1381 = dma.done.wait (%p1513_p1), [#allocation10], 512  }
  0x35   : > { %1383 = vsyncadd (%p1513_p1), [#allocation10], 4294966784  ;;  %vm430_vm0 = vcmask 261120   ;;  %v1609_v0 = vld [vmem:[%s372_s29] sm:$0xff]  ;;  %v1418_v2 = vmov 32.0   ;;  %v1023_v16 = vld [vmem:[#allocation8] sm:$0xff] }
  0x36   : > { %v431_v1 = vsel %vm430_vm0, %v1609_v0, 0.0  ;;  %1150 = vrcp.f32 %v1418_v2  ;;  %v1024_v14 = vld [vmem:[#allocation8 + $0x8] sm:$0xff]  ;;  %v1026_v15 = vld [vmem:[#allocation9 + $0x8] sm:$0xff]  ;;  %v1025_v17 = vld [vmem:[#allocation9] sm:$0xff]  ;;  %vm542_vm5 = vcmask 64512   ;;  %s1419_s22 = smov 112  }
  0x37   : > { %432 = vadd.xlane.f32.xlu0 %v431_v1  ;;  %500 = vmatpush.bf16.msra.mxu0 %v1024_v14  ;;  %v1145_v27 = vld [vmem:[#allocation6] ss:$0 sm:$0xff]  ;;  %v1146_v30 = vld [vmem:[%s1707_s2] ss:$0 sm:$0xff]  ;;  %s1420_s18 = smov 120   ;;  %s1421_s19 = smov 104  }
  0x38   : > { %533 = vmatpush.bf16.msra.mxu1 %v1026_v15  ;;  %v1148_v34 = vld [vmem:[%s1711_s6] ss:$0 sm:$0xff]  ;;  %s1422_s28 = smov 88   ;;  %vm580_vm6 = vcmask 1043456   ;;  %s1423_s27 = smov 96   ;;  %vm600_vm7 = vcmask 60416  }
  0x39   : > { %v1147_v35 = vld [vmem:[%s1709_s4] ss:$0 sm:$0xff]  ;;  %s1424_s29 = smov 72   ;;  %s1425_s1 = smov 80   ;;  %vm666_vm8 = vcmask 126016   ;;  %vm729_vm9 = vcmask 191616  }
  0x3a   : > { %s1426_s3 = smov 16   ;;  %s1427_s5 = smov 8   ;;  %vm792_vm10 = vcmask 257216  }
  0x3b   : > { %501 = vmatpush.bf16.msra.mxu0 %v1023_v16  ;;  %s1428_s16 = smov 24   ;;  %s1020_s20 = sshll.u32 %s1402_s12, 3 }
  0x3c   : > { %v1151_v3 = vpop.eup %1150  ;;  %534 = vmatpush.bf16.msra.mxu1 %v1025_v17  ;;  %s834_s12 = scalar_lea.sflag [#allocation5], %s1591_s25 }
  0x3d   : > { %v435_v4 = vmul.f32 32.0, %v1151_v3  ;;  %vm439_vm1 = vweird.f32 %v1151_v3 }
  0x3f   : > { %v436_v5 = vsub.f32 1.0, %v435_v4 }
  0x41   : > { %v437_v6 = vmul.f32 %v1151_v3, %v436_v5 }
  0x43   : > { %v438_v7 = vadd.f32 %v1151_v3, %v437_v6 }
  0x45   : > { %v440_v8 = vsel %vm439_vm1, %v1151_v3, %v438_v7 }
  0xaa   : > { %v433_v9 = vpop.xlane.xlu0 %432 }
  0xab   : > { %v441_v10 = vmul.f32 %v440_v8, %v433_v9 }
  0xad   : > { %v442_v11 = vsub.f32 %v1609_v0, %v441_v10 }
  0xaf   : > { %v443_v12 = vmul.f32 %v442_v11, %v442_v11 }
  0xb1   : > { %v444_v13 = vsel %vm430_vm0, %v443_v12, 0.0 }
  0xb2   : > { %445 = vadd.xlane.f32.xlu0 %v444_v13 }
 0x125   : > { %v446_v18 = vpop.xlane.xlu0 %445 }
 0x126   : > { %v447_v19 = vmul.f32 %v446_v18, %v440_v8 }
 0x128   : > { %v448_v20 = vadd.f32 1e-05, %v447_v19 }
 0x12a   : > { %1152 = vrsqrt.f32 %v448_v20  ;;  %vm455_vm3 = vweird.f32 %v448_v20 }
 0x130   : > { %v1153_v21 = vpop.eup %1152 }
 0x131   : > { %v450_v22 = vmul.f32 %v1153_v21, %v448_v20  ;;  %vm456_vm2 = vweird.f32 %v1153_v21 }
 0x132   : > { %vm457_vm4 = vmor %vm455_vm3, %vm456_vm2 }
 0x133   : > { %v451_v23 = vmul.f32 %v1153_v21, %v450_v22 }
 0x135   : > { %v452_v24 = vmul.f32 0.5, %v451_v23 }
 0x137   : > { %v453_v25 = vsub.f32 1.5, %v452_v24 }
 0x139   : > { %v454_v26 = vmul.f32 %v1153_v21, %v453_v25 }
 0x13b   : > { %v458_v28 = vsel %vm457_vm4, %v1153_v21, %v454_v26 }
 0x13c   : > { %v459_v29 = vmul.f32 %v458_v28, %v442_v11 }
 0x13e   : > { %v464_v31 = vmul.f32 %v1145_v27, %v459_v29 }
 0x140   : > { %v469_v32 = vadd.f32 %v1146_v30, %v464_v31 }
 0x142   : > { %v470_v33 = vpack.c.bf16 %v469_v32, %v469_v32 }
 0x144   : > { %992 = vmatmul.msk.bf16.vlgmr.msra.gmra.mxu0 %vm430_vm0, %v470_v33  ;;  %1001 = vmatmul.msk.bf16.vlgmr.msra.gmra.mxu1 %vm430_vm0, %v470_v33 }
 0x1c1   : > { %v503_v36 = vpop.f32.mrf.mxu0  ;;  %v536_v37 = vpop.f32.mrf.mxu1 }
 0x1c2   : > { %v537_v38 = vadd.f32 %v1148_v34, %v536_v37  ;;  %v504_v39 = vadd.f32 %v1147_v35, %v503_v36 }
 0x1c4   : > { %v541_v40 = vpack.c.bf16 %v537_v38, %v537_v38  ;;  %v540_v43 = vpack.c.bf16 %v504_v39, %v504_v39 }
 0x1c6   : > { %v573_v41 = vunpack.c.l.b16 %v541_v40  ;;  %v547_v42 = vsel %vm542_vm5, %v541_v40, 0  ;;  %v603_v47 = vunpack.c.l.b16 %v540_v43 }
 0x1c7   : > { %556 = vmatpush.bf16.xpose.msra.mxu2 %v547_v42 }
 0x1c8   : > { %v1627_v44 = vpack.c.b16 %v573_v41, %v573_v41  ;;  %v604_v48 = vpack.c.b16 %v603_v47, %v603_v47 }
 0x1c9   : > { %v505_v45 = vpop.f32.mrf.mxu0  ;;  %v538_v46 = vpop.f32.mrf.mxu1 }
 0x1ca   : > { %670 = vrot.lane.b32.xlu0 %v1627_v44, %s1419_s22  ;;  %607 = vrot.lane.b32.xlu2 %v1627_v44, %s1420_s18 }
 0x1ce   : > { %1002 = vmatmul.msk.bf16.vlgmr.msra.gmra.mxu2 %vm542_vm5, %v540_v43 }
 0x1d2   : > { %605 = vrot.lane.b32.xlu2 %v604_v48, %s1420_s18 }
 0x1da   : > { %733 = vrot.lane.b32.xlu2 %v1627_v44, %s1421_s19 }
 0x1e2   : > { %668 = vrot.lane.b32.xlu2 %v604_v48, %s1419_s22 }
 0x1ea   : > { %731 = vrot.lane.b32.xlu2 %v604_v48, %s1421_s19 }
 0x1f2   : > { %638 = vrot.lane.b32.xlu2 %v1627_v44, %s1422_s28  ;;  %s845_s28 = scalar_lea.hbm %s1714_s9, %s1020_s20 }
 0x224   : > { %v608_v49 = vpop.permute.xlu2 %607 }
 0x225   : > { %v613_v7 = vsel %vm542_vm5, %v608_v49, 0 }
 0x22c   : > { %v606_v50 = vpop.permute.xlu2 %605 }
 0x234   : > { %v734_v51 = vpop.permute.xlu2 %733 }
 0x235   : > { %v739_v9 = vsel %vm542_vm5, %v734_v51, 0 }
 0x23c   : > { %v671_v52 = vpop.permute.xlu0 %670  ;;  %v669_v53 = vpop.permute.xlu2 %668 }
 0x23d   : > { %v676_v54 = vsel %vm542_vm5, %v671_v52, 0 }
 0x23e   : > { %685 = vmatpush.bf16.xpose.msrb.mxu1 %v676_v54 }
 0x244   : > { %v732_v55 = vpop.permute.xlu2 %731 }
 0x245   : > { %1006 = vmatmul.msk.bf16.vlgmr.msrb.gmra.mxu1 %vm542_vm5, %v669_v53 }
 0x24c   : > { %v639_v56 = vpop.permute.xlu2 %638 }
 0x24d   : > { %v644_v57 = vsel %vm580_vm6, %v639_v56, 0 }
 0x24e   : > { %653 = vmatpush.bf16.msrb.mxu0 %v644_v57 }
 0x251   : > { %v558_v58 = vpop.f32.mrf.mxu2 }
 0x252   : > { %v562_v59 = vsel %vm542_vm5, %v558_v58, -inf }
 0x253   : > { %563 = vmax.xlane.f32.xlu1 %v562_v59 }
 0x259   : > { %v560_v60 = vpop.f32.mrf.mxu2 }
 0x26c   : > { %575 = vrot.lane.b32.xlu1 %v1627_v44, %s1423_s27  ;;  %s427_s27 = scalar_lea.vmem [#allocation12], %s978_s17  ;;  %s1340_s17 = scalar_lea.hbm %s1714_s9, 16 }
 0x2c2   : > { %v687_v61 = vpop.f32.mrf.mxu1 }
 0x2c3   : > { %v691_v62 = vsel %vm542_vm5, %v687_v61, -inf }
 0x2c4   : > { %692 = vmax.xlane.f32.xlu0 %v691_v62 }
 0x2c6   : > { %v564_v1 = vpop.xlane.xlu1 %563 }
 0x2c7   : > { %v565_v2 = vsub.f32 %v558_v58, %v564_v1  ;;  %v1027_v1 = vld [vmem:[#allocation11] sm:$0xff] }
 0x2c9   : > { %v566_v3 = vmul.f32 1.442695, %v565_v2 }
 0x2ca   : > { %v689_v63 = vpop.f32.mrf.mxu1 }
 0x2cb   : > { %1154 = vpow2.f32 %v566_v3  ;;  %v1028_v63 = vld [vmem:[#allocation11 + $0x8] sm:$0xff] }
 0x2cc   : > { %824 = vmatpush.bf16.msra.mxu1 %v1028_v63 }
 0x2d0   : > { %825 = vmatpush.bf16.msra.mxu1 %v1027_v1 }
 0x2d1   : > { %v1155_v4 = vpop.eup %1154 }
 0x2d2   : > { %v571_v8 = vpack.c.bf16 %v1155_v4, %v1155_v4  ;;  %v568_v25 = vsel %vm542_vm5, %v1155_v4, 0.0 }
 0x2d8   : > { %764 = vrot.lane.b32.xlu0 %v1627_v44, %s1424_s29  ;;  %s847_s29 = sshll.u32 %s427_s27, 4  ;;  %s848_s29 = int_to_ptr.vmem [resolvable:$true] %s847_s29 }
 0x2de   : > { %v576_v5 = vpop.permute.xlu1 %575 }
 0x2df   : > { %v582_v6 = vsel %vm580_vm6, %v576_v5, 0 }
 0x2e0   : > { %591 = vmatpush.bf16.msra.mxu3 %v582_v6  ;;  %v1149_v6 = vld [vmem:[%s1713_s8] ss:$0 sm:$0xff] }
 0x2e3   : > { %1003 = vmatmul.msk.bf16.vlgmr.msra.gmra.mxu3 %vm542_vm5, %v571_v8 }
 0x2e4   : > { %622 = vmatpush.bf16.xpose.msrb.mxu3 %v613_v7 }
 0x2ec   : > { %748 = vmatpush.bf16.xpose.msra.mxu3 %v739_v9 }
 0x2f3   : > { %1004 = vmatmul.msk.bf16.vlgmr.msrb.gmra.mxu3 %vm542_vm5, %v606_v50 }
 0x303   : > { %1008 = vmatmul.msk.bf16.vlgmr.msra.gmra.mxu3 %vm542_vm5, %v732_v55 }
 0x337   : > { %v693_v10 = vpop.xlane.xlu0 %692 }
 0x338   : > { %v694_v17 = vsub.f32 %v687_v61, %v693_v10 }
 0x33a   : > { %v695_v19 = vmul.f32 1.442695, %v694_v17 }
 0x33c   : > { %1156 = vpow2.f32 %v695_v19 }
 0x342   : > { %v1157_v22 = vpop.eup %1156 }
 0x343   : > { %v697_v24 = vsel %vm542_vm5, %v1157_v22, 0.0  ;;  %v700_v38 = vpack.c.bf16 %v1157_v22, %v1157_v22 }
 0x34a   : > { %v765_v11 = vpop.permute.xlu0 %764 }
 0x34b   : > { %v770_v12 = vsel %vm580_vm6, %v765_v11, 0 }
 0x34c   : > { %779 = vmatpush.bf16.msra.mxu0 %v770_v12 }
 0x366   : > { %v593_v13 = vpop.f32.mrf.mxu3 }
 0x36e   : > { %v595_v14 = vpop.f32.mrf.mxu3 }
 0x376   : > { %v624_v15 = vpop.f32.mrf.mxu3 }
 0x377   : > { %v628_v16 = vsel %vm542_vm5, %v624_v15, -inf }
 0x378   : > { %629 = vmax.xlane.f32.xlu1 %v628_v16 }
 0x37e   : > { %v626_v18 = vpop.f32.mrf.mxu3 }
 0x386   : > { %v750_v20 = vpop.f32.mrf.mxu3 }
 0x387   : > { %v754_v21 = vsel %vm542_vm5, %v750_v20, -inf }
 0x388   : > { %755 = vmax.xlane.f32.xlu2 %v754_v21 }
 0x38e   : > { %v752_v23 = vpop.f32.mrf.mxu3 }
 0x390   : > { %698 = vadd.xlane.f32.xlu2 %v697_v24 }
 0x391   : > { %701 = vrot.lane.b32.xlu1 %v1627_v44, %s1425_s1  ;;  %s849_s1 = sshll.u32 %s845_s28, 4  ;;  %s850_s1 = int_to_ptr.hbm [resolvable:$true] %s849_s1 }
 0x3bb   : > { %569 = vadd.xlane.f32.xlu1 %v568_v25 }
 0x3eb   : > { %v630_v26 = vpop.xlane.xlu1 %629 }
 0x3ec   : > { %v631_v27 = vsub.f32 %v624_v15, %v630_v26 }
 0x3ee   : > { %v632_v28 = vmul.f32 1.442695, %v631_v27 }
 0x3f0   : > { %1158 = vpow2.f32 %v632_v28 }
 0x3f6   : > { %v1159_v29 = vpop.eup %1158 }
 0x3f7   : > { %v634_v30 = vsel %vm542_vm5, %v1159_v29, 0.0  ;;  %v637_v31 = vpack.c.bf16 %v1159_v29, %v1159_v29 }
 0x3f8   : > { %635 = vadd.xlane.f32.xlu2 %v634_v30 }
 0x3f9   : > { %1005 = vmatmul.msk.bf16.vlgmr.msrb.gmra.mxu0 %vm542_vm5, %v637_v31 }
 0x3fb   : > { %v756_v32 = vpop.xlane.xlu2 %755 }
 0x3fc   : > { %v757_v33 = vsub.f32 %v750_v20, %v756_v32 }
 0x3fe   : > { %v758_v34 = vmul.f32 1.442695, %v757_v33 }
 0x400   : > { %1160 = vpow2.f32 %v758_v34 }
 0x403   : > { %v702_v35 = vpop.permute.xlu1 %701  ;;  %v699_v47 = vpop.xlane.xlu2 %698 }
 0x404   : > { %v707_v36 = vsel %vm580_vm6, %v702_v35, 0 }
 0x405   : > { %716 = vmatpush.bf16.msrb.mxu2 %v707_v36 }
 0x406   : > { %v1161_v37 = vpop.eup %1160 }
 0x407   : > { %v763_v39 = vpack.c.bf16 %v1161_v37, %v1161_v37  ;;  %v760_v40 = vsel %vm542_vm5, %v1161_v37, 0.0 }
 0x408   : > { %1007 = vmatmul.msk.bf16.vlgmr.msrb.gmra.mxu2 %vm542_vm5, %v700_v38  ;;  %761 = vadd.xlane.f32.xlu0 %v760_v40 }
 0x409   : > { %1009 = vmatmul.msk.bf16.vlgmr.msra.gmra.mxu0 %vm542_vm5, %v763_v39 }
 0x42e   : > { %v570_v41 = vpop.xlane.xlu1 %569 }
 0x42f   : > { %1162 = vrcp.f32 %v570_v41 }
 0x430   : > { %1164 = vrcp.f32 %v699_v47 }
 0x435   : > { %v1163_v42 = vpop.eup %1162 }
 0x436   : > { %v598_v43 = vmul.f32 %v1163_v42, %v593_v13  ;;  %v1165_v50 = vpop.eup %1164 }
 0x438   : > { %v599_v44 = vpack.c.bf16 %v598_v43, %v598_v43 }
 0x43a   : > { %601 = vst.msk [vmem:[#allocation2] sm:$0xf] %vm600_vm7, %v599_v44 }
 0x46b   : > { %v636_v49 = vpop.xlane.xlu2 %635 }
 0x46c   : > { %1166 = vrcp.f32 %v636_v49 }
 0x472   : > { %v1167_v56 = vpop.eup %1166 }
 0x476   : > { %v655_v45 = vpop.f32.mrf.mxu0 }
 0x477   : > { %v660_v57 = vmul.f32 %v1167_v56, %v655_v45 }
 0x479   : > { %v661_v59 = vpack.c.bf16 %v660_v57, %v660_v57 }
 0x47b   : > { %v762_v55 = vpop.xlane.xlu0 %761 }
 0x47c   : > { %1168 = vrcp.f32 %v762_v55 }
 0x47e   : > { %v657_v46 = vpop.f32.mrf.mxu0 }
 0x482   : > { %v1169_v60 = vpop.eup %1168 }
 0x486   : > { %v781_v48 = vpop.f32.mrf.mxu0 }
 0x487   : > { %v786_v61 = vmul.f32 %v1169_v60, %v781_v48 }
 0x489   : > { %v787_v62 = vpack.c.bf16 %v786_v61, %v786_v61 }
 0x48b   : > { %v718_v51 = vpop.f32.mrf.mxu2 }
 0x48c   : > { %v723_v52 = vmul.f32 %v1165_v50, %v718_v51 }
 0x48e   : > { %v724_v53 = vpack.c.bf16 %v723_v52, %v723_v52  ;;  %v783_v54 = vpop.f32.mrf.mxu0 }
 0x490   : > { %726 = vrot.lane.b32.xlu2 %v724_v53, %s1426_s3  ;;  %s1334_s3 = sshra.s32 %s850_s1, 4  ;;  %s1335_s3 = int_to_ptr.hbm [resolvable:$true] %s1334_s3 }
 0x491   : > { %p1341_p9 = scmp.lt.s32.totalorder %s1335_s3, %s1714_s9 }
 0x493   : > { %v720_v58 = vpop.f32.mrf.mxu2 }
 0x498   : > { %663 = vrot.lane.b32.xlu2 %v661_v59, %s1427_s5  ;;  %s1336_s5 = scalar_lea.hbm %s1335_s3, 8 }
 0x499   : > { %p1337_p1 = scmp.ne.s32.totalorder %s1335_s3, %s1336_s5  ;;  %p1342_p10 = scmp.lt.s32.totalorder %s1340_s17, %s1336_s5 }
 0x49b   : > { %p1338_p3 = pnand %p1337_p1, %p1571_p0  ;;  %p1343_p12 = por %p1342_p10, %p1341_p9 }
 0x49d   : > { %p1339_p8 = pneg %p1338_p3 }
 0x49f   : > { %p1344_p13 = pnand %p1343_p12, %p1339_p8 }
 0x4a0   : > { %789 = vrot.lane.b32.xlu2 %v787_v62, %s1428_s16 }
 0x4ea   : > { %v727_v2 = vpop.permute.xlu2 %726 }
 0x4f2   : > { %v664_v3 = vpop.permute.xlu2 %663 }
 0x4f3   : > { %667 = vst.msk [vmem:[#allocation2] sm:$0xf] %vm666_vm8, %v664_v3 }
 0x4f4   : > { %730 = vst.msk [vmem:[#allocation2] sm:$0xf] %vm729_vm9, %v727_v2 }
 0x4fa   : > { %v790_v4 = vpop.permute.xlu2 %789 }
 0x4fb   : > { %793 = vst.msk [vmem:[#allocation2] sm:$0xf] %vm792_vm10, %v790_v4 }
 0x502   : > { %v794_v5 = vld [vmem:[#allocation2] sm:$0xf] }
 0x503   : > { %1018 = vmatmul.msk.bf16.vlgmr.msra.gmra.mxu1 %vm430_vm0, %v794_v5 }
 0x580   : > { %v827_v7 = vpop.f32.mrf.mxu1 }
 0x581   : > { %v828_v8 = vadd.f32 %v1149_v6, %v827_v7 }
 0x583   : > { %v831_v9 = vadd.f32 %v828_v8, %v1609_v0 }
 0x585   : > { %832 = vst.msk [vmem:[%s427_s27] sm:$0xff] %vm430_vm0, %v831_v9 }
 0x586   : > { %1347 = shalt.err (!%p1344_p13)
}
 0x587   : > { %1047 = dma.vmem_to_hbm [thread:$0]  (%p1571_p0), %s848_s29, 128, %s850_s1, %s834_s12  }
 0x588   : > { %v829_v0 = vpop.f32.mrf.mxu1 }
 0x589 PF: > { %s861_s25 = sand.u32 1, %s1390_s30   ;;  %p1067_p2 = pnand %p974_p4, %p1578_p6 }
 0x58a   : > { %s862_s18 = scalar_lea.sflag [#allocation5], %s861_s25 }
 0x58b   : > { %p1068_p5 = pneg %p1067_p2 }
 0x58d   : > { %1385 = dma.done.wait (%p1068_p5), %s862_s18, 128  }
 0x58e   : > { %1387 = vsyncadd (%p1068_p5), %s862_s18, 4294967168  ;;  %s27_s14 = sadd.s32 1, %s1410_s14   ;;  %s1729_s30 = smov %s1394_s10 }
 0x58f   : > { %p24_p7 = scmp.ge.s32.totalorder %s27_s14, 4   ;;  %s1730_s10 = smov %s1398_s11 }
 0x590   : > { %s1731_s11 = smov %s1576_s21  ;;  %s1732_s12 = smov %s1406_s13 }
 0x591   : > { %s1733_s13 = smov %s1735_s26  ;;  %26 = sbr.rel (!%p24_p7) target bundleno = 12 (0xc), region = 117 }
 0x596   :  { %868 = vsyncpa [#allocation4], 1 }
 0x597   :  { %870 = vsyncpa [#allocation4 + $0x1], 1 }
 0x598   :  { %871 = vsyncpa [#allocation7], 1 }
 0x599   :  { %872 = vsyncpa [#allocation10], 1 }
 0x59a   :  { %873 = vsyncpa [#allocation5], 1 }
 0x59b   :  { %875 = vsyncpa [#allocation5 + $0x1], 1 }

// kernel: tpu_custom_call.1
= control target key start
LH: loop header
LB: loop body
LE: loop exit
PB: predicated region body
PF: predicated region fallthrough
CT: control target
= control target key end

     0   :  { %s1705_s0 = inlined_call_operand.hbm [shape: f32[2,8,32], index: 0, kind: input, shape index: {}]   ;;  %s1706_s1 = inlined_call_operand.hbm [shape: f32[1,32], index: 1, kind: input, shape index: {}]   ;;  %s1707_s2 = inlined_call_operand.vmem [shape: f32[1,32], index: 2, kind: input, shape index: {}]   ;;  %s1708_s3 = inlined_call_operand.hbm [shape: bf16[32,32], index: 3, kind: input, shape index: {}]   ;;  %s1709_s4 = inlined_call_operand.vmem [shape: f32[1,32], index: 4, kind: input, shape index: {}]   ;;  %s1710_s5 = inlined_call_operand.hbm [shape: bf16[32,64], index: 5, kind: input, shape index: {}]   ;;  %s1711_s6 = inlined_call_operand.vmem [shape: f32[1,64], index: 6, kind: input, shape index: {}]   ;;  %s1712_s7 = inlined_call_operand.hbm [shape: bf16[32,32], index: 7, kind: input, shape index: {}]   ;;  %s1713_s8 = inlined_call_operand.vmem [shape: f32[1,32], index: 8, kind: input, shape index: {}]   ;;  %s1714_s9 = inlined_call_operand.hbm [shape: f32[2,8,32], index: 9, kind: output, shape index: {}]  }
   0x1   :  { %1716 = sst [smem:[#allocation17_spill]] %s1706_s1 }
   0x2   :  { %1717 = sst [smem:[#allocation18_spill]] %s1708_s3 }
   0x3   :  { %1718 = sst [smem:[#allocation19_spill]] %s1710_s5 }
   0x4   :  { %14 = vsyncpa [#allocation4], 0 }
   0x5   :  { %16 = vsyncpa [#allocation4 + $0x1], 0 }
   0x6   :  { %17 = vsyncpa [#allocation7], 0 }
   0x7   :  { %18 = vsyncpa [#allocation10], 0 }
   0x8   :  { %19 = vsyncpa [#allocation5], 0 }
   0x9   :  { %21 = vsyncpa [#allocation5 + $0x1], 0  ;;  %s1479_s30 = smov 0   ;;  %s1481_s10 = smov 0  }
   0xa   :  { %s1483_s11 = smov 0   ;;  %s1485_s12 = smov 0  }
   0xb   :  { %s1487_s13 = smov 0   ;;  %s1489_s14 = smov 0  }
   0xc LB: > { %s1715_s15 = sadd.s32 4294967295, %s1410_s14   ;;  %p969_p0 = scmp.ge.s32.totalorder %s1410_s14, 1  ;;  %s1410_s14 = sphi %s1489_s14, %s27_s14   ;;  %s1406_s13 = sphi %s1487_s13, %s1733_s13   ;;  %s1402_s12 = sphi %s1485_s12, %s1732_s12   ;;  %s1398_s11 = sphi %s1483_s11, %s1731_s11   ;;  %s1394_s10 = sphi %s1481_s10, %s1730_s10   ;;  %s1390_s30 = sphi %s1479_s30, %s1729_s30  }
   0xd   : > { %p1513_p1 = scmp.eq.s32.totalorder %s1715_s15, 0  ;;  %p266_p2 = scmp.lt.s32.totalorder %s1410_s14, 3 }
   0xe   : > { %s1720_s1 = sld [smem:[#allocation17_spill]]  ;;  %p974_p4 = scmp.ge.s32.totalorder %s1410_s14, 2 }
   0xf   : > { %p1521_p3 = pnand %p969_p0, %p266_p2  ;;  %s1412_s21 = smov [#allocation6]  }
  0x10   : > { %s280_s22 = sshll.u32 %s1412_s21, 4  ;;  %s1723_s5 = sld [smem:[#allocation19_spill]]  ;;  %s281_s22 = int_to_ptr.vmem [resolvable:$true] %s280_s22 }
  0x11   : > { %p1049_p5 = pneg %p1521_p3  ;;  %s1413_s27 = smov [#allocation9]  }
  0x12   : > { %s311_s28 = sshll.u32 %s1413_s27, 4  ;;  %s1724_s3 = sld [smem:[#allocation18_spill]]  ;;  %s312_s28 = int_to_ptr.vmem [resolvable:$true] %s311_s28 }
  0x13   : > { %p1530_p6 = pnand %p1049_p5, %p1513_p1  ;;  %s1414_s21 = smov 64  }
  0x14   : > { %s278_s19 = sshll.u32 %s1720_s1, 4  ;;  %s1415_s24 = smov 4   ;;  %s279_s19 = int_to_ptr.hbm [resolvable:$true] %s278_s19 }
  0x15   : > { %1052 = dma.hbm_to_vmem [thread:$0]  (!%p1530_p6), %s279_s19, 16, %s281_s22, [#allocation7]  }
  0x16   : > { %s309_s26 = sshll.u32 %s1723_s5, 4  ;;  %s326_s22 = sshll.u32 %s1712_s7, 4  ;;  %s310_s26 = int_to_ptr.hbm [resolvable:$true] %s309_s26  ;;  %s327_s22 = int_to_ptr.hbm [resolvable:$true] %s326_s22 }
  0x17   : > { %1058 = dma.hbm_to_vmem [thread:$0]  (!%p1530_p6), %s310_s26, 256, %s312_s28, [#allocation10], %s1414_s21, %s1414_s21, %s1415_s24  }
  0x18   : > { %s292_s18 = sshll.u32 %s1724_s3, 4  ;;  %s1416_s27 = smov [#allocation8]   ;;  %s293_s18 = int_to_ptr.hbm [resolvable:$true] %s292_s18 }
  0x19   : > { %s294_s29 = sshll.u32 %s1416_s27, 4  ;;  %s1417_s17 = smov [#allocation11]   ;;  %s295_s29 = int_to_ptr.vmem [resolvable:$true] %s294_s29 }
  0x1a   : > { %1055 = dma.hbm_to_vmem [thread:$0]  (!%p1530_p6), %s293_s18, 256, %s295_s29, [#allocation7], %s1414_s21, %s1414_s21, %s1415_s24  }
  0x1b   : > { %s328_s15 = sshll.u32 %s1417_s17, 4  ;;  %s39_s26 = sadd.s32 1, %s1406_s13  ;;  %s329_s15 = int_to_ptr.vmem [resolvable:$true] %s328_s15 }
  0x1c   : > { %1061 = dma.hbm_to_vmem [thread:$0]  (!%p1530_p6), %s327_s22, 256, %s329_s15, [#allocation10], %s1414_s21, %s1414_s21, %s1415_s24  }
  0x1d   : > { %s968_s28 = sadd.s32 4294967294, %s1410_s14   ;;  %p41_p7 = scmp.ge.s32.totalorder %s39_s26, 2 }
  0x1e   : > { %s46_s25 = sadd.s32 1, %s1398_s11  ;;  %p53_p8 = scmp.ne.s32.totalorder %s1398_s11, %s1394_s10 }
  0x1f   : > { %s1735_s26 = smov (%p41_p7, %s39_s26), 0  ;;  %p54_p9 = scmp.eq.s32.totalorder %s1410_s14, 0 }
  0x20   : > { %p59_p10 = scmp.ne.s32.totalorder %s1394_s10, %s1390_s30  ;;  %s43_s18 = ssub.s32 %s1406_s13, %s1735_s26 }
  0x21   : > { %s1725_s19 = sadd.s32 4294967295, %s1410_s14   ;;  %p44_p12 = scmp.eq.s32.totalorder %s43_s18, 0 }
  0x22   : > { %p253_p11 = scmp.eq.s32.totalorder %s1725_s19, 1  ;;  %p1567_p13 = por %p1513_p1, %p59_p10 }
  0x23   : > { %p259_p2 = scmp.eq.s32.totalorder %s968_s28, 1  ;;  %p55_p5 = por %p54_p9, %p53_p8 }
  0x24   : > { %p1571_p0 = por %p253_p11, %p53_p8  ;;  %s345_s22 = sand.u32 1, %s1398_s11  }
  0x25   : > { %s1576_s21 = scalar_select %p44_p12, %s1398_s11, %s46_s25  }
  0x26   : > { %p1578_p6 = por %p259_p2, %p59_p10  ;;  %s976_s27 = sshll.u32 %s1406_s13, 3 }
  0x27   : > { %p1074_p7 = scmp.lt.s32.totalorder %s1410_s14, 2  ;;  %s975_s29 = sshll.u32 %s345_s22, 3 }
  0x28   : > { %s353_s19 = scalar_lea.hbm %s1705_s0, %s976_s27  ;;  %s349_s3 = scalar_lea.vmem [#allocation3], %s975_s29 }
  0x29   : > { %s355_s1 = sshll.u32 %s353_s19, 4  ;;  %s357_s5 = sshll.u32 %s349_s3, 4  ;;  %s356_s1 = int_to_ptr.hbm [resolvable:$true] %s355_s1  ;;  %s358_s5 = int_to_ptr.vmem [resolvable:$true] %s357_s5 }
  0x2a   : > { %p1063_p11 = pnand %p1074_p7, %p55_p5  ;;  %s346_s28 = scalar_lea.sflag [#allocation4], %s345_s22 }
  0x2b   : > { %366 = sbr.rel (%p1521_p3) target bundleno = 1417 (0x589), region = 56  ;;  %s1591_s25 = sand.u32 (!%p1521_p3), 1, %s1394_s10  }
  0x2c   : > { %1065 = dma.hbm_to_vmem [thread:$0]  (!%p1063_p11), %s356_s1, 128, %s358_s5, %s346_s28  }
  0x2d   : > { %s978_s17 = sshll.u32 (!%p1521_p3), %s1591_s25, 3  ;;  %s369_s27 = scalar_lea.sflag (!%p1521_p3), [#allocation4], %s1591_s25 }
  0x2e   : > { %s372_s29 = scalar_lea.vmem (!%p1521_p3), [#allocation3], %s978_s17 }
  0x30   : > { %1373 = dma.done.wait (%p1567_p13), %s369_s27, 128  }
  0x31   : > { %1375 = vsyncadd (%p1567_p13), %s369_s27, 4294967168 }
  0x32   : > { %1377 = dma.done.wait (%p1513_p1), [#allocation7], 272  }
  0x33   : > { %1379 = vsyncadd (%p1513_p1), [#allocation7], 4294967024 }
  0x34   : > { %1381 = dma.done.wait (%p1513_p1), [#allocation10], 512  }
  0x35   : > { %1383 = vsyncadd (%p1513_p1), [#allocation10], 4294966784  ;;  %vm430_vm0 = vcmask 261120   ;;  %v1609_v0 = vld [vmem:[%s372_s29] sm:$0xff]  ;;  %v1418_v2 = vmov 32.0   ;;  %v1023_v16 = vld [vmem:[#allocation8] sm:$0xff] }
  0x36   : > { %v431_v1 = vsel %vm430_vm0, %v1609_v0, 0.0  ;;  %1150 = vrcp.f32 %v1418_v2  ;;  %v1024_v14 = vld [vmem:[#allocation8 + $0x8] sm:$0xff]  ;;  %v1026_v15 = vld [vmem:[#allocation9 + $0x8] sm:$0xff]  ;;  %v1025_v17 = vld [vmem:[#allocation9] sm:$0xff]  ;;  %vm542_vm5 = vcmask 64512   ;;  %s1419_s22 = smov 112  }
  0x37   : > { %432 = vadd.xlane.f32.xlu0 %v431_v1  ;;  %500 = vmatpush.bf16.msra.mxu0 %v1024_v14  ;;  %v1145_v27 = vld [vmem:[#allocation6] ss:$0 sm:$0xff]  ;;  %v1146_v30 = vld [vmem:[%s1707_s2] ss:$0 sm:$0xff]  ;;  %s1420_s18 = smov 120   ;;  %s1421_s19 = smov 104  }
  0x38   : > { %533 = vmatpush.bf16.msra.mxu1 %v1026_v15  ;;  %v1148_v34 = vld [vmem:[%s1711_s6] ss:$0 sm:$0xff]  ;;  %s1422_s28 = smov 88   ;;  %vm580_vm6 = vcmask 1043456   ;;  %s1423_s27 = smov 96   ;;  %vm600_vm7 = vcmask 60416  }
  0x39   : > { %v1147_v35 = vld [vmem:[%s1709_s4] ss:$0 sm:$0xff]  ;;  %s1424_s29 = smov 72   ;;  %s1425_s1 = smov 80   ;;  %vm666_vm8 = vcmask 126016   ;;  %vm729_vm9 = vcmask 191616  }
  0x3a   : > { %s1426_s3 = smov 16   ;;  %s1427_s5 = smov 8   ;;  %vm792_vm10 = vcmask 257216  }
  0x3b   : > { %501 = vmatpush.bf16.msra.mxu0 %v1023_v16  ;;  %s1428_s16 = smov 24   ;;  %s1020_s20 = sshll.u32 %s1402_s12, 3 }
  0x3c   : > { %v1151_v3 = vpop.eup %1150  ;;  %534 = vmatpush.bf16.msra.mxu1 %v1025_v17  ;;  %s834_s12 = scalar_lea.sflag [#allocation5], %s1591_s25 }
  0x3d   : > { %v435_v4 = vmul.f32 32.0, %v1151_v3  ;;  %vm439_vm1 = vweird.f32 %v1151_v3 }
  0x3f   : > { %v436_v5 = vsub.f32 1.0, %v435_v4 }
  0x41   : > { %v437_v6 = vmul.f32 %v1151_v3, %v436_v5 }
  0x43   : > { %v438_v7 = vadd.f32 %v1151_v3, %v437_v6 }
  0x45   : > { %v440_v8 = vsel %vm439_vm1, %v1151_v3, %v438_v7 }
  0xaa   : > { %v433_v9 = vpop.xlane.xlu0 %432 }
  0xab   : > { %v441_v10 = vmul.f32 %v440_v8, %v433_v9 }
  0xad   : > { %v442_v11 = vsub.f32 %v1609_v0, %v441_v10 }
  0xaf   : > { %v443_v12 = vmul.f32 %v442_v11, %v442_v11 }
  0xb1   : > { %v444_v13 = vsel %vm430_vm0, %v443_v12, 0.0 }
  0xb2   : > { %445 = vadd.xlane.f32.xlu0 %v444_v13 }
 0x125   : > { %v446_v18 = vpop.xlane.xlu0 %445 }
 0x126   : > { %v447_v19 = vmul.f32 %v446_v18, %v440_v8 }
 0x128   : > { %v448_v20 = vadd.f32 1e-05, %v447_v19 }
 0x12a   : > { %1152 = vrsqrt.f32 %v448_v20  ;;  %vm455_vm3 = vweird.f32 %v448_v20 }
 0x130   : > { %v1153_v21 = vpop.eup %1152 }
 0x131   : > { %v450_v22 = vmul.f32 %v1153_v21, %v448_v20  ;;  %vm456_vm2 = vweird.f32 %v1153_v21 }
 0x132   : > { %vm457_vm4 = vmor %vm455_vm3, %vm456_vm2 }
 0x133   : > { %v451_v23 = vmul.f32 %v1153_v21, %v450_v22 }
 0x135   : > { %v452_v24 = vmul.f32 0.5, %v451_v23 }
 0x137   : > { %v453_v25 = vsub.f32 1.5, %v452_v24 }
 0x139   : > { %v454_v26 = vmul.f32 %v1153_v21, %v453_v25 }
 0x13b   : > { %v458_v28 = vsel %vm457_vm4, %v1153_v21, %v454_v26 }
 0x13c   : > { %v459_v29 = vmul.f32 %v458_v28, %v442_v11 }
 0x13e   : > { %v464_v31 = vmul.f32 %v1145_v27, %v459_v29 }
 0x140   : > { %v469_v32 = vadd.f32 %v1146_v30, %v464_v31 }
 0x142   : > { %v470_v33 = vpack.c.bf16 %v469_v32, %v469_v32 }
 0x144   : > { %992 = vmatmul.msk.bf16.vlgmr.msra.gmra.mxu0 %vm430_vm0, %v470_v33  ;;  %1001 = vmatmul.msk.bf16.vlgmr.msra.gmra.mxu1 %vm430_vm0, %v470_v33 }
 0x1c1   : > { %v503_v36 = vpop.f32.mrf.mxu0  ;;  %v536_v37 = vpop.f32.mrf.mxu1 }
 0x1c2   : > { %v537_v38 = vadd.f32 %v1148_v34, %v536_v37  ;;  %v504_v39 = vadd.f32 %v1147_v35, %v503_v36 }
 0x1c4   : > { %v541_v40 = vpack.c.bf16 %v537_v38, %v537_v38  ;;  %v540_v43 = vpack.c.bf16 %v504_v39, %v504_v39 }
 0x1c6   : > { %v573_v41 = vunpack.c.l.b16 %v541_v40  ;;  %v547_v42 = vsel %vm542_vm5, %v541_v40, 0  ;;  %v603_v47 = vunpack.c.l.b16 %v540_v43 }
 0x1c7   : > { %556 = vmatpush.bf16.xpose.msra.mxu2 %v547_v42 }
 0x1c8   : > { %v1627_v44 = vpack.c.b16 %v573_v41, %v573_v41  ;;  %v604_v48 = vpack.c.b16 %v603_v47, %v603_v47 }
 0x1c9   : > { %v505_v45 = vpop.f32.mrf.mxu0  ;;  %v538_v46 = vpop.f32.mrf.mxu1 }
 0x1ca   : > { %670 = vrot.lane.b32.xlu0 %v1627_v44, %s1419_s22  ;;  %607 = vrot.lane.b32.xlu2 %v1627_v44, %s1420_s18 }
 0x1ce   : > { %1002 = vmatmul.msk.bf16.vlgmr.msra.gmra.mxu2 %vm542_vm5, %v540_v43 }
 0x1d2   : > { %605 = vrot.lane.b32.xlu2 %v604_v48, %s1420_s18 }
 0x1da   : > { %733 = vrot.lane.b32.xlu2 %v1627_v44, %s1421_s19 }
 0x1e2   : > { %668 = vrot.lane.b32.xlu2 %v604_v48, %s1419_s22 }
 0x1ea   : > { %731 = vrot.lane.b32.xlu2 %v604_v48, %s1421_s19 }
 0x1f2   : > { %638 = vrot.lane.b32.xlu2 %v1627_v44, %s1422_s28  ;;  %s845_s28 = scalar_lea.hbm %s1714_s9, %s1020_s20 }
 0x224   : > { %v608_v49 = vpop.permute.xlu2 %607 }
 0x225   : > { %v613_v7 = vsel %vm542_vm5, %v608_v49, 0 }
 0x22c   : > { %v606_v50 = vpop.permute.xlu2 %605 }
 0x234   : > { %v734_v51 = vpop.permute.xlu2 %733 }
 0x235   : > { %v739_v9 = vsel %vm542_vm5, %v734_v51, 0 }
 0x23c   : > { %v671_v52 = vpop.permute.xlu0 %670  ;;  %v669_v53 = vpop.permute.xlu2 %668 }
 0x23d   : > { %v676_v54 = vsel %vm542_vm5, %v671_v52, 0 }
 0x23e   : > { %685 = vmatpush.bf16.xpose.msrb.mxu1 %v676_v54 }
 0x244   : > { %v732_v55 = vpop.permute.xlu2 %731 }
 0x245   : > { %1006 = vmatmul.msk.bf16.vlgmr.msrb.gmra.mxu1 %vm542_vm5, %v669_v53 }
 0x24c   : > { %v639_v56 = vpop.permute.xlu2 %638 }
 0x24d   : > { %v644_v57 = vsel %vm580_vm6, %v639_v56, 0 }
 0x24e   : > { %653 = vmatpush.bf16.msrb.mxu0 %v644_v57 }
 0x251   : > { %v558_v58 = vpop.f32.mrf.mxu2 }
 0x252   : > { %v562_v59 = vsel %vm542_vm5, %v558_v58, -inf }
 0x253   : > { %563 = vmax.xlane.f32.xlu1 %v562_v59 }
 0x259   : > { %v560_v60 = vpop.f32.mrf.mxu2 }
 0x26c   : > { %575 = vrot.lane.b32.xlu1 %v1627_v44, %s1423_s27  ;;  %s427_s27 = scalar_lea.vmem [#allocation12], %s978_s17  ;;  %s1340_s17 = scalar_lea.hbm %s1714_s9, 16 }
 0x2c2   : > { %v687_v61 = vpop.f32.mrf.mxu1 }
 0x2c3   : > { %v691_v62 = vsel %vm542_vm5, %v687_v61, -inf }
 0x2c4   : > { %692 = vmax.xlane.f32.xlu0 %v691_v62 }
 0x2c6   : > { %v564_v1 = vpop.xlane.xlu1 %563 }
 0x2c7   : > { %v565_v2 = vsub.f32 %v558_v58, %v564_v1  ;;  %v1027_v1 = vld [vmem:[#allocation11] sm:$0xff] }
 0x2c9   : > { %v566_v3 = vmul.f32 1.442695, %v565_v2 }
 0x2ca   : > { %v689_v63 = vpop.f32.mrf.mxu1 }
 0x2cb   : > { %1154 = vpow2.f32 %v566_v3  ;;  %v1028_v63 = vld [vmem:[#allocation11 + $0x8] sm:$0xff] }
 0x2cc   : > { %824 = vmatpush.bf16.msra.mxu1 %v1028_v63 }
 0x2d0   : > { %825 = vmatpush.bf16.msra.mxu1 %v1027_v1 }
 0x2d1   : > { %v1155_v4 = vpop.eup %1154 }
 0x2d2   : > { %v571_v8 = vpack.c.bf16 %v1155_v4, %v1155_v4  ;;  %v568_v25 = vsel %vm542_vm5, %v1155_v4, 0.0 }
 0x2d8   : > { %764 = vrot.lane.b32.xlu0 %v1627_v44, %s1424_s29  ;;  %s847_s29 = sshll.u32 %s427_s27, 4  ;;  %s848_s29 = int_to_ptr.vmem [resolvable:$true] %s847_s29 }
 0x2de   : > { %v576_v5 = vpop.permute.xlu1 %575 }
 0x2df   : > { %v582_v6 = vsel %vm580_vm6, %v576_v5, 0 }
 0x2e0   : > { %591 = vmatpush.bf16.msra.mxu3 %v582_v6  ;;  %v1149_v6 = vld [vmem:[%s1713_s8] ss:$0 sm:$0xff] }
 0x2e3   : > { %1003 = vmatmul.msk.bf16.vlgmr.msra.gmra.mxu3 %vm542_vm5, %v571_v8 }
 0x2e4   : > { %622 = vmatpush.bf16.xpose.msrb.mxu3 %v613_v7 }
 0x2ec   : > { %748 = vmatpush.bf16.xpose.msra.mxu3 %v739_v9 }
 0x2f3   : > { %1004 = vmatmul.msk.bf16.vlgmr.msrb.gmra.mxu3 %vm542_vm5, %v606_v50 }
 0x303   : > { %1008 = vmatmul.msk.bf16.vlgmr.msra.gmra.mxu3 %vm542_vm5, %v732_v55 }
 0x337   : > { %v693_v10 = vpop.xlane.xlu0 %692 }
 0x338   : > { %v694_v17 = vsub.f32 %v687_v61, %v693_v10 }
 0x33a   : > { %v695_v19 = vmul.f32 1.442695, %v694_v17 }
 0x33c   : > { %1156 = vpow2.f32 %v695_v19 }
 0x342   : > { %v1157_v22 = vpop.eup %1156 }
 0x343   : > { %v697_v24 = vsel %vm542_vm5, %v1157_v22, 0.0  ;;  %v700_v38 = vpack.c.bf16 %v1157_v22, %v1157_v22 }
 0x34a   : > { %v765_v11 = vpop.permute.xlu0 %764 }
 0x34b   : > { %v770_v12 = vsel %vm580_vm6, %v765_v11, 0 }
 0x34c   : > { %779 = vmatpush.bf16.msra.mxu0 %v770_v12 }
 0x366   : > { %v593_v13 = vpop.f32.mrf.mxu3 }
 0x36e   : > { %v595_v14 = vpop.f32.mrf.mxu3 }
 0x376   : > { %v624_v15 = vpop.f32.mrf.mxu3 }
 0x377   : > { %v628_v16 = vsel %vm542_vm5, %v624_v15, -inf }
 0x378   : > { %629 = vmax.xlane.f32.xlu1 %v628_v16 }
 0x37e   : > { %v626_v18 = vpop.f32.mrf.mxu3 }
 0x386   : > { %v750_v20 = vpop.f32.mrf.mxu3 }
 0x387   : > { %v754_v21 = vsel %vm542_vm5, %v750_v20, -inf }
 0x388   : > { %755 = vmax.xlane.f32.xlu2 %v754_v21 }
 0x38e   : > { %v752_v23 = vpop.f32.mrf.mxu3 }
 0x390   : > { %698 = vadd.xlane.f32.xlu2 %v697_v24 }
 0x391   : > { %701 = vrot.lane.b32.xlu1 %v1627_v44, %s1425_s1  ;;  %s849_s1 = sshll.u32 %s845_s28, 4  ;;  %s850_s1 = int_to_ptr.hbm [resolvable:$true] %s849_s1 }
 0x3bb   : > { %569 = vadd.xlane.f32.xlu1 %v568_v25 }
 0x3eb   : > { %v630_v26 = vpop.xlane.xlu1 %629 }
 0x3ec   : > { %v631_v27 = vsub.f32 %v624_v15, %v630_v26 }
 0x3ee   : > { %v632_v28 = vmul.f32 1.442695, %v631_v27 }
 0x3f0   : > { %1158 = vpow2.f32 %v632_v28 }
 0x3f6   : > { %v1159_v29 = vpop.eup %1158 }
 0x3f7   : > { %v634_v30 = vsel %vm542_vm5, %v1159_v29, 0.0  ;;  %v637_v31 = vpack.c.bf16 %v1159_v29, %v1159_v29 }
 0x3f8   : > { %635 = vadd.xlane.f32.xlu2 %v634_v30 }
 0x3f9   : > { %1005 = vmatmul.msk.bf16.vlgmr.msrb.gmra.mxu0 %vm542_vm5, %v637_v31 }
 0x3fb   : > { %v756_v32 = vpop.xlane.xlu2 %755 }
 0x3fc   : > { %v757_v33 = vsub.f32 %v750_v20, %v756_v32 }
 0x3fe   : > { %v758_v34 = vmul.f32 1.442695, %v757_v33 }
 0x400   : > { %1160 = vpow2.f32 %v758_v34 }
 0x403   : > { %v702_v35 = vpop.permute.xlu1 %701  ;;  %v699_v47 = vpop.xlane.xlu2 %698 }
 0x404   : > { %v707_v36 = vsel %vm580_vm6, %v702_v35, 0 }
 0x405   : > { %716 = vmatpush.bf16.msrb.mxu2 %v707_v36 }
 0x406   : > { %v1161_v37 = vpop.eup %1160 }
 0x407   : > { %v763_v39 = vpack.c.bf16 %v1161_v37, %v1161_v37  ;;  %v760_v40 = vsel %vm542_vm5, %v1161_v37, 0.0 }
 0x408   : > { %1007 = vmatmul.msk.bf16.vlgmr.msrb.gmra.mxu2 %vm542_vm5, %v700_v38  ;;  %761 = vadd.xlane.f32.xlu0 %v760_v40 }
 0x409   : > { %1009 = vmatmul.msk.bf16.vlgmr.msra.gmra.mxu0 %vm542_vm5, %v763_v39 }
 0x42e   : > { %v570_v41 = vpop.xlane.xlu1 %569 }
 0x42f   : > { %1162 = vrcp.f32 %v570_v41 }
 0x430   : > { %1164 = vrcp.f32 %v699_v47 }
 0x435   : > { %v1163_v42 = vpop.eup %1162 }
 0x436   : > { %v598_v43 = vmul.f32 %v1163_v42, %v593_v13  ;;  %v1165_v50 = vpop.eup %1164 }
 0x438   : > { %v599_v44 = vpack.c.bf16 %v598_v43, %v598_v43 }
 0x43a   : > { %601 = vst.msk [vmem:[#allocation2] sm:$0xf] %vm600_vm7, %v599_v44 }
 0x46b   : > { %v636_v49 = vpop.xlane.xlu2 %635 }
 0x46c   : > { %1166 = vrcp.f32 %v636_v49 }
 0x472   : > { %v1167_v56 = vpop.eup %1166 }
 0x476   : > { %v655_v45 = vpop.f32.mrf.mxu0 }
 0x477   : > { %v660_v57 = vmul.f32 %v1167_v56, %v655_v45 }
 0x479   : > { %v661_v59 = vpack.c.bf16 %v660_v57, %v660_v57 }
 0x47b   : > { %v762_v55 = vpop.xlane.xlu0 %761 }
 0x47c   : > { %1168 = vrcp.f32 %v762_v55 }
 0x47e   : > { %v657_v46 = vpop.f32.mrf.mxu0 }
 0x482   : > { %v1169_v60 = vpop.eup %1168 }
 0x486   : > { %v781_v48 = vpop.f32.mrf.mxu0 }
 0x487   : > { %v786_v61 = vmul.f32 %v1169_v60, %v781_v48 }
 0x489   : > { %v787_v62 = vpack.c.bf16 %v786_v61, %v786_v61 }
 0x48b   : > { %v718_v51 = vpop.f32.mrf.mxu2 }
 0x48c   : > { %v723_v52 = vmul.f32 %v1165_v50, %v718_v51 }
 0x48e   : > { %v724_v53 = vpack.c.bf16 %v723_v52, %v723_v52  ;;  %v783_v54 = vpop.f32.mrf.mxu0 }
 0x490   : > { %726 = vrot.lane.b32.xlu2 %v724_v53, %s1426_s3  ;;  %s1334_s3 = sshra.s32 %s850_s1, 4  ;;  %s1335_s3 = int_to_ptr.hbm [resolvable:$true] %s1334_s3 }
 0x491   : > { %p1341_p9 = scmp.lt.s32.totalorder %s1335_s3, %s1714_s9 }
 0x493   : > { %v720_v58 = vpop.f32.mrf.mxu2 }
 0x498   : > { %663 = vrot.lane.b32.xlu2 %v661_v59, %s1427_s5  ;;  %s1336_s5 = scalar_lea.hbm %s1335_s3, 8 }
 0x499   : > { %p1337_p1 = scmp.ne.s32.totalorder %s1335_s3, %s1336_s5  ;;  %p1342_p10 = scmp.lt.s32.totalorder %s1340_s17, %s1336_s5 }
 0x49b   : > { %p1338_p3 = pnand %p1337_p1, %p1571_p0  ;;  %p1343_p12 = por %p1342_p10, %p1341_p9 }
 0x49d   : > { %p1339_p8 = pneg %p1338_p3 }
 0x49f   : > { %p1344_p13 = pnand %p1343_p12, %p1339_p8 }
 0x4a0   : > { %789 = vrot.lane.b32.xlu2 %v787_v62, %s1428_s16 }
 0x4ea   : > { %v727_v2 = vpop.permute.xlu2 %726 }
 0x4f2   : > { %v664_v3 = vpop.permute.xlu2 %663 }
 0x4f3   : > { %667 = vst.msk [vmem:[#allocation2] sm:$0xf] %vm666_vm8, %v664_v3 }
 0x4f4   : > { %730 = vst.msk [vmem:[#allocation2] sm:$0xf] %vm729_vm9, %v727_v2 }
 0x4fa   : > { %v790_v4 = vpop.permute.xlu2 %789 }
 0x4fb   : > { %793 = vst.msk [vmem:[#allocation2] sm:$0xf] %vm792_vm10, %v790_v4 }
 0x502   : > { %v794_v5 = vld [vmem:[#allocation2] sm:$0xf] }
 0x503   : > { %1018 = vmatmul.msk.bf16.vlgmr.msra.gmra.mxu1 %vm430_vm0, %v794_v5 }
 0x580   : > { %v827_v7 = vpop.f32.mrf.mxu1 }
 0x581   : > { %v828_v8 = vadd.f32 %v1149_v6, %v827_v7 }
 0x583   : > { %v831_v9 = vadd.f32 %v828_v8, %v1609_v0 }
 0x585   : > { %832 = vst.msk [vmem:[%s427_s27] sm:$0xff] %vm430_vm0, %v831_v9 }
 0x586   : > { %1347 = shalt.err (!%p1344_p13)
}
 0x587   : > { %1047 = dma.vmem_to_hbm [thread:$0]  (%p1571_p0), %s848_s29, 128, %s850_s1, %s834_s12  }
 0x588   : > { %v829_v0 = vpop.f32.mrf.mxu1 }
 0x589 PF: > { %s861_s25 = sand.u32 1, %s1390_s30   ;;  %p1067_p2 = pnand %p974_p4, %p1578_p6 }
 0x58a   : > { %s862_s18 = scalar_lea.sflag [#allocation5], %s861_s25 }
 0x58b   : > { %p1068_p5 = pneg %p1067_p2 }
 0x58d   : > { %1385 = dma.done.wait (%p1068_p5), %s862_s18, 128  }
 0x58e   : > { %1387 = vsyncadd (%p1068_p5), %s862_s18, 4294967168  ;;  %s27_s14 = sadd.s32 1, %s1410_s14   ;;  %s1729_s30 = smov %s1394_s10 }
 0x58f   : > { %p24_p7 = scmp.ge.s32.totalorder %s27_s14, 4   ;;  %s1730_s10 = smov %s1398_s11 }
 0x590   : > { %s1731_s11 = smov %s1576_s21  ;;  %s1732_s12 = smov %s1406_s13 }
 0x591   : > { %s1733_s13 = smov %s1735_s26  ;;  %26 = sbr.rel (!%p24_p7) target bundleno = 12 (0xc), region = 117 }
 0x596   :  { %868 = vsyncpa [#allocation4], 1 }
 0x597   :  { %870 = vsyncpa [#allocation4 + $0x1], 1 }
 0x598   :  { %871 = vsyncpa [#allocation7], 1 }
 0x599   :  { %872 = vsyncpa [#allocation10], 1 }
 0x59a   :  { %873 = vsyncpa [#allocation5], 1 }
 0x59b   :  { %875 = vsyncpa [#allocation5 + $0x1], 1 }

</bundles_post_ra>
